<compile_context>
chip_gen: v6e
topology: v6e:2x2x1
jax: 0.10.0
libtpu: 0.0.40
codegen_flags: <defaults>
</compile_context>

<pallas_src>
import functools

import numpy as np
import jax
import jax.numpy as jnp
from jax.experimental import pallas as pl
from jax.experimental.pallas import tpu as pltpu

LANE = 128


def _round_up(v, m):
    return (v + m - 1) // m * m


# ---------------------------------------------------------------------------
# Static 0/1 matrices (numpy, built once per shape at trace time)
# ---------------------------------------------------------------------------
def _offset_indicator(W, dx):
    """E[w', w] = 1 iff w' == w + dx (valid input column for output col w)."""
    e = np.zeros((W, W), np.float32)
    for w in range(W):
        wp = w + dx
        if 0 <= wp < W:
            e[wp, w] = 1.0
    return e


def _row_shift_mats(H, nb):
    """(6, nb*H, nb*H): row shifts dy=-2,-1,+1,+2 (zero fill, per image) and
    clamped shifts dy=-1,+1 (for the max-pool), block-diagonal over images."""
    def shift(dy):
        m = np.zeros((H, H), np.float32)
        for h in range(H):
            j = h + dy
            if 0 <= j < H:
                m[h, j] = 1.0
        return m

    def clamp_shift(dy):
        m = np.zeros((H, H), np.float32)
        for h in range(H):
            m[h, min(max(h + dy, 0), H - 1)] = 1.0
        return m

    mats = [shift(-2), shift(-1), shift(1), shift(2),
            clamp_shift(-1), clamp_shift(1)]
    eye = np.eye(nb, dtype=np.float32)
    return np.stack([np.kron(eye, m) for m in mats])


def _lane_clamp_mats(W, Cin):
    """(2, W*Cin, W*Cin): right-multiply permutations selecting the clamped
    w-1 / w+1 neighbour in the lane-flattened (w, ci) layout (max-pool)."""
    L = W * Cin
    out = []
    for dw in (-1, 1):
        m = np.zeros((L, L), np.float32)
        for w in range(W):
            ws = min(max(w + dw, 0), W - 1)
            for ci in range(Cin):
                m[ws * Cin + ci, w * Cin + ci] = 1.0
        out.append(m)
    return np.stack(out)


# ---------------------------------------------------------------------------
# Parameter folding: conv(+BN scale) -> banded lane-space matmul weights
# ---------------------------------------------------------------------------
def _band_weight(w_hwio, scale, ch_off, ct_out, W, row_pad):
    """KxK conv (stride 1, pad K//2) as K stacked banded matrices.

    Returns (K*row_pad, W*ct_out) f32.  Block k holds the dy = k - K//2 tap:
    row w'*Ci+ci (rows >= W*Ci are zero pad), column w*ct_out + ch_off + co.
    Foreign output channels are exactly zero (relu-add invariant).
    """
    K, _, Ci, Co = w_hwio.shape
    r = K // 2
    wf = w_hwio * scale.reshape(1, 1, 1, Co)          # fold BN scale
    blocks = []
    for k in range(K):                                # dy tap
        acc = jnp.zeros((W, Ci, W, ct_out), jnp.float32)
        for j in range(K):                            # dx tap
            e = jnp.asarray(_offset_indicator(W, j - r))
            kern = jnp.zeros((Ci, ct_out), jnp.float32)
            kern = kern.at[:, ch_off:ch_off + Co].set(wf[k, j])
            acc = acc + jnp.einsum('uw,ic->uiwc', e, kern)
        blk = acc.reshape(W * Ci, W * ct_out)
        if row_pad > W * Ci:
            blk = jnp.pad(blk, ((0, row_pad - W * Ci), (0, 0)))
        blocks.append(blk)
    return jnp.concatenate(blocks, axis=0)


def _lane_bias(shift, ch_off, ct_out, W):
    """(1, W*ct_out) bias embedded at channel offset ch_off (zeros elsewhere)."""
    co = shift.shape[-1]
    b = jnp.zeros((ct_out,), jnp.float32).at[ch_off:ch_off + co].set(
        shift.reshape(-1))
    return jnp.tile(b, W).reshape(1, W * ct_out)


# ---------------------------------------------------------------------------
# Fused kernel: `nb` images per grid step; everything stays in registers/VMEM.
# ---------------------------------------------------------------------------
def _inception_kernel(x_ref, wf_ref, bf_ref, w2b_ref, s2b_ref, w3b_ref,
                      s3b_ref, w4_ref, s4_ref, rm_ref, lm_ref, o_ref):
    nb, H, Lin = x_ref.shape
    Lout = o_ref.shape[-1]                     # W * Ct
    R2 = w2b_ref.shape[0] // 3                 # 128-aligned reduce widths
    R3 = w3b_ref.shape[0] // 5
    f32 = jnp.float32
    bf16 = jnp.bfloat16

    x = x_ref[...].reshape(nb * H, Lin)        # bf16, rows = (image, h)

    # ---- stage 1: fused 1x1s (branch-1 + 3x3-reduce + 5x5-reduce), BN+ReLU --
    z = jnp.maximum(
        jnp.dot(x, wf_ref[...], preferred_element_type=f32) + bf_ref[...], 0.0)
    y = z[:, :Lout]                            # branch-1, channels [0, C1)
    r2 = z[:, Lout:Lout + R2].astype(bf16)     # 3x3-reduce activations (padded)
    r3 = z[:, Lout + R2:Lout + R2 + R3].astype(bf16)

    def rshift(k, v):                          # rows -> rows shifted by dy (0 fill)
        return jnp.dot(rm_ref[k], v, preferred_element_type=f32).astype(bf16)

    # ---- stage 2: 3x3 branch (pad 1): 3 row taps, one banded matmul ---------
    r2cat = jnp.concatenate([rshift(1, r2), r2, rshift(2, r2)], axis=1)
    y = y + jnp.maximum(
        jnp.dot(r2cat, w2b_ref[...], preferred_element_type=f32)
        + s2b_ref[...], 0.0)

    # ---- stage 3: 5x5 branch (pad 2): 5 row taps, one banded matmul ---------
    r3cat = jnp.concatenate(
        [rshift(0, r3), rshift(1, r3), r3, rshift(2, r3), rshift(3, r3)],
        axis=1)
    y = y + jnp.maximum(
        jnp.dot(r3cat, w3b_ref[...], preferred_element_type=f32)
        + s3b_ref[...], 0.0)

    # ---- stage 4: 3x3/s1/p1 max-pool (separable, clamp-replicated borders) --
    xf = x.astype(f32)
    up = jnp.dot(rm_ref[4], x, preferred_element_type=f32)   # row h-1 (clamped)
    dn = jnp.dot(rm_ref[5], x, preferred_element_type=f32)   # row h+1 (clamped)
    rowmax = jnp.maximum(jnp.maximum(up, dn), xf)
    rmb = rowmax.astype(bf16)
    lt = jnp.dot(rmb, lm_ref[0], preferred_element_type=f32)  # col w-1 (clamped)
    rt = jnp.dot(rmb, lm_ref[1], preferred_element_type=f32)  # col w+1 (clamped)
    pooled = jnp.maximum(jnp.maximum(lt, rt), rowmax).astype(bf16)
    y = y + jnp.maximum(
        jnp.dot(pooled, w4_ref[...], preferred_element_type=f32)
        + s4_ref[...], 0.0)

    # ---- single lane-dense (H, W*Ct) output store ---------------------------
    o_ref[...] = y.reshape(nb, H, Lout)


# ---------------------------------------------------------------------------
# Public forward: NCHW in, NCHW out (matches the PyTorch module)
# ---------------------------------------------------------------------------
@functools.partial(jax.jit, static_argnames=("images_per_step",))
def inception_block(x_nchw, params, images_per_step=1):
    N, Cin, H, W = x_nchw.shape
    nb = images_per_step
    assert N % nb == 0, "batch must be divisible by images_per_step"

    w1, sc1, sh1 = params['p1']
    w2a, sc2a, sh2a = params['p2a']
    w2b, sc2b, sh2b = params['p2b']
    w3a, sc3a, sh3a = params['p3a']
    w3b, sc3b, sh3b = params['p3b']
    w4, sc4, sh4 = params['p4']

    C1, C2r, C2 = w1.shape[-1], w2a.shape[-1], w2b.shape[-1]
    C3r, C3, C4 = w3a.shape[-1], w3b.shape[-1], w4.shape[-1]
    Ct = C1 + C2 + C3 + C4
    Lin, Lout = W * Cin, W * Ct
    R2 = _round_up(W * C2r, LANE)              # 128-aligned reduce lane widths
    R3 = _round_up(W * C3r, LANE)
    Lz = Lout + R2 + R3
    bdt = jnp.bfloat16                         # MXU operand dtype (f32 accum)

    # fused 1x1 stage weight: [branch-1 @ ch 0 | 3x3-reduce | 5x5-reduce]
    wf = jnp.concatenate([
        _band_weight(w1, sc1, 0, Ct, W, Lin),
        jnp.pad(_band_weight(w2a, sc2a, 0, C2r, W, Lin),
                ((0, 0), (0, R2 - W * C2r))),
        jnp.pad(_band_weight(w3a, sc3a, 0, C3r, W, Lin),
                ((0, 0), (0, R3 - W * C3r))),
    ], axis=1).astype(bdt)                                         # (Lin, Lz)
    bfv = jnp.concatenate([
        _lane_bias(sh1, 0, Ct, W),
        jnp.pad(jnp.tile(sh2a.reshape(-1), W).reshape(1, W * C2r),
                ((0, 0), (0, R2 - W * C2r))),
        jnp.pad(jnp.tile(sh3a.reshape(-1), W).reshape(1, W * C3r),
                ((0, 0), (0, R3 - W * C3r))),
    ], axis=1)                                                     # (1, Lz) f32

    w2b_band = _band_weight(w2b, sc2b, C1, Ct, W, R2).astype(bdt)  # (3*R2, Lout)
    s2b = _lane_bias(sh2b, C1, Ct, W)
    w3b_band = _band_weight(w3b, sc3b, C1 + C2, Ct, W, R3).astype(bdt)
    s3b = _lane_bias(sh3b, C1 + C2, Ct, W)
    w4_band = _band_weight(w4, sc4, C1 + C2 + C3, Ct, W, Lin).astype(bdt)
    s4 = _lane_bias(sh4, C1 + C2 + C3, Ct, W)

    rowmats = jnp.asarray(_row_shift_mats(H, nb), bdt)   # (6, nb*H, nb*H)
    lanemats = jnp.asarray(_lane_clamp_mats(W, Cin), bdt)  # (2, Lin, Lin)

    # lane-dense input slab: (N, H, W*Cin), bf16
    x = jnp.transpose(x_nchw, (0, 2, 3, 1)).reshape(N, H, Lin).astype(bdt)

    const2 = lambda shape: pl.BlockSpec(shape, lambda n: (0, 0))
    const3 = lambda shape: pl.BlockSpec(shape, lambda n: (0, 0, 0))

    out = pl.pallas_call(
        _inception_kernel,
        out_shape=jax.ShapeDtypeStruct((N, H, Lout), jnp.float32),
        grid=(N // nb,),
        in_specs=[
            pl.BlockSpec((nb, H, Lin), lambda n: (n, 0, 0)),
            const2((Lin, Lz)), const2((1, Lz)),             # fused 1x1
            const2((3 * R2, Lout)), const2((1, Lout)),      # 3x3 branch
            const2((5 * R3, Lout)), const2((1, Lout)),      # 5x5 branch
            const2((Lin, Lout)), const2((1, Lout)),         # pool proj
            const3((6, nb * H, nb * H)),                    # row shift mats
            const3((2, Lin, Lin)),                          # lane clamp mats
        ],
        out_specs=pl.BlockSpec((nb, H, Lout), lambda n: (n, 0, 0)),
        compiler_params=pltpu.CompilerParams(
            dimension_semantics=("parallel",),
            vmem_limit_bytes=32 * 1024 * 1024),
    )(x, wf, bfv, w2b_band, s2b, w3b_band, s3b, w4_band, s4, rowmats, lanemats)

    return jnp.transpose(out.reshape(N, H, W, Ct), (0, 3, 1, 2))   # -> NCHW


# ---------------------------------------------------------------------------
# Pure-JAX reference (eval-mode BN folded the same way) for a self-check
# ---------------------------------------------------------------------------
def _reference(x, params):
    def conv_bn_relu(v, p, pad):
        w, scale, shift = p
        y = jax.lax.conv_general_dilated(
            v, w, window_strides=(1, 1), padding=[(pad, pad), (pad, pad)],
            dimension_numbers=('NCHW', 'HWIO', 'NCHW'))
        s = scale.reshape(1, -1, 1, 1)
        b = shift.reshape(1, -1, 1, 1)
        return jnp.maximum(y * s + b, 0.0)

    def maxpool3(v):
        return jax.lax.reduce_window(
            v, -jnp.inf, jax.lax.max, (1, 1, 3, 3), (1, 1, 1, 1),
            [(0, 0), (0, 0), (1, 1), (1, 1)])

    p1 = conv_bn_relu(x, params['p1'], 0)
    p2 = conv_bn_relu(conv_bn_relu(x, params['p2a'], 0), params['p2b'], 1)
    p3 = conv_bn_relu(conv_bn_relu(x, params['p3a'], 0), params['p3b'], 2)
    p4 = conv_bn_relu(maxpool3(x), params['p4'], 0)
    return jnp.concatenate([p1, p2, p3, p4], axis=1)


# ---------------------------------------------------------------------------
# Synthetic deterministic parameters (Conv2d + eval-mode BatchNorm2d folded)
# ---------------------------------------------------------------------------
def init_conv_bn(key, cin, cout, k):
    k1, k2, k3, k4, k5, k6 = jax.random.split(key, 6)
    w = jax.random.normal(k1, (k, k, cin, cout), jnp.float32) * 0.1   # HWIO
    b = jax.random.normal(k2, (cout,), jnp.float32) * 0.1
    gamma = jax.random.uniform(k3, (cout,), jnp.float32, 0.5, 1.5)
    beta = jax.random.normal(k4, (cout,), jnp.float32) * 0.1
    run_mean = jax.random.normal(k5, (cout,), jnp.float32) * 0.1
    run_var = jax.random.uniform(k6, (cout,), jnp.float32, 0.5, 1.5)
    scale = gamma / jnp.sqrt(run_var + 1e-5)
    shift = beta + (b - run_mean) * scale
    return w, scale.reshape(1, cout), shift.reshape(1, cout)


def init_inception_params(key, channel_list):
    ks = jax.random.split(key, 6)
    cin = channel_list['input']
    return {
        'p1':  init_conv_bn(ks[0], cin, channel_list['#1x1'], 1),
        'p2a': init_conv_bn(ks[1], cin, channel_list['#3x3 reduce'], 1),
        'p2b': init_conv_bn(ks[2], channel_list['#3x3 reduce'],
                            channel_list['#3x3'], 3),
        'p3a': init_conv_bn(ks[3], cin, channel_list['#5x5 reduce'], 1),
        'p3b': init_conv_bn(ks[4], channel_list['#5x5 reduce'],
                            channel_list['#5x5'], 5),
        'p4':  init_conv_bn(ks[5], cin, channel_list['pool proj'], 1),
    }


if __name__ == "__main__":
    channel_list = {
        'input': 4,
        '#1x1': 8,
        '#3x3 reduce': 4,
        '#3x3': 8,
        '#5x5 reduce': 4,
        '#5x5': 8,
        'pool proj': 8,
    }
    key = jax.random.PRNGKey(0)
    kx, kp = jax.random.split(key)
    x = jax.random.normal(kx, (2, channel_list['input'], 16, 16), jnp.float32)
    params = init_inception_params(kp, channel_list)

    out = inception_block(x, params)
    out = jax.block_until_ready(out)

    expected_c = (channel_list['#1x1'] + channel_list['#3x3'] +
                  channel_list['#5x5'] + channel_list['pool proj'])
    assert out.shape == (2, expected_c, 16, 16), out.shape
    assert bool(jnp.all(jnp.isfinite(out))), "non-finite values in output"

    # Self-check vs. a pure-JAX f32 reference (bf16 MXU operands => loose tol).
    ref = jax.jit(_reference)(x, params)
    num = jnp.sqrt(jnp.sum((out - ref) ** 2))
    den = jnp.sqrt(jnp.sum(ref ** 2)) + 1e-6
    rel = float(num / den)
    assert rel < 0.05, f"relative error vs reference too large: {rel}"

    print("KERNEL_OK")
</pallas_src>

<mosaic_0001>
module attributes {stable_mosaic.version = 11 : i64} {
  func.func @_inception_kernel(%arg0: i32, %arg1: memref<1x16x64xbf16, #tpu.memory_space<vmem>>, %arg2: memref<64x768xbf16, #tpu.memory_space<vmem>>, %arg3: memref<1x768xf32, #tpu.memory_space<vmem>>, %arg4: memref<384x512xbf16, #tpu.memory_space<vmem>>, %arg5: memref<1x512xf32, #tpu.memory_space<vmem>>, %arg6: memref<640x512xbf16, #tpu.memory_space<vmem>>, %arg7: memref<1x512xf32, #tpu.memory_space<vmem>>, %arg8: memref<64x512xbf16, #tpu.memory_space<vmem>>, %arg9: memref<1x512xf32, #tpu.memory_space<vmem>>, %arg10: memref<6x16x16xbf16, #tpu.memory_space<vmem>>, %arg11: memref<2x64x64xbf16, #tpu.memory_space<vmem>>, %arg12: memref<1x16x512xf32, #tpu.memory_space<vmem>>) attributes {dimension_semantics = [#tpu.dimension_semantics<parallel>], iteration_bounds = array<i64: 2>, scalar_prefetch = 0 : i64, scratch_operands = 0 : i64, tpu.core_type = #tpu.core_type<tc>, window_params = [{transform_indices = @transform_0, window_bounds = array<i64: 1, 16, 64>}, {pipeline_mode = #tpu.pipeline_mode<synchronous>, transform_indices = @transform_1, window_bounds = array<i64: 64, 768>}, {pipeline_mode = #tpu.pipeline_mode<synchronous>, transform_indices = @transform_2, window_bounds = array<i64: 1, 768>}, {pipeline_mode = #tpu.pipeline_mode<synchronous>, transform_indices = @transform_3, window_bounds = array<i64: 384, 512>}, {pipeline_mode = #tpu.pipeline_mode<synchronous>, transform_indices = @transform_4, window_bounds = array<i64: 1, 512>}, {pipeline_mode = #tpu.pipeline_mode<synchronous>, transform_indices = @transform_5, window_bounds = array<i64: 640, 512>}, {pipeline_mode = #tpu.pipeline_mode<synchronous>, transform_indices = @transform_6, window_bounds = array<i64: 1, 512>}, {pipeline_mode = #tpu.pipeline_mode<synchronous>, transform_indices = @transform_7, window_bounds = array<i64: 64, 512>}, {pipeline_mode = #tpu.pipeline_mode<synchronous>, transform_indices = @transform_8, window_bounds = array<i64: 1, 512>}, {pipeline_mode = #tpu.pipeline_mode<synchronous>, transform_indices = @transform_9, window_bounds = array<i64: 6, 16, 16>}, {pipeline_mode = #tpu.pipeline_mode<synchronous>, transform_indices = @transform_10, window_bounds = array<i64: 2, 64, 64>}, {transform_indices = @transform_11, window_bounds = array<i64: 1, 16, 512>}]} {
    %c0 = arith.constant 0 : index
    %c0_0 = arith.constant 0 : index
    %c0_1 = arith.constant 0 : index
    %0 = vector.load %arg1[%c0, %c0_0, %c0_1] : memref<1x16x64xbf16, #tpu.memory_space<vmem>>, vector<1x16x64xbf16>
    %1 = vector.shape_cast %0 : vector<1x16x64xbf16> to vector<16x64xbf16>
    %c0_2 = arith.constant 0 : index
    %c0_3 = arith.constant 0 : index
    %2 = vector.load %arg2[%c0_2, %c0_3] : memref<64x768xbf16, #tpu.memory_space<vmem>>, vector<64x768xbf16>
    %cst = arith.constant dense<0.000000e+00> : vector<16x768xf32>
    %3 = tpu.matmul %1, %2, %cst {dimension_numbers = #tpu.dot_dimension_numbers<[1], [0], [0], [1], [0, 0, 1, 1], [], []>} : vector<16x64xbf16>, vector<64x768xbf16>, vector<16x768xf32> -> vector<16x768xf32>
    %c0_4 = arith.constant 0 : index
    %c0_5 = arith.constant 0 : index
    %4 = vector.load %arg3[%c0_4, %c0_5] : memref<1x768xf32, #tpu.memory_space<vmem>>, vector<1x768xf32>
    %5 = vector.broadcast %4 : vector<1x768xf32> to vector<16x768xf32>
    %6 = arith.addf %3, %5 : vector<16x768xf32>
    %cst_6 = arith.constant 0.000000e+00 : f32
    %7 = vector.broadcast %cst_6 : f32 to vector<16x768xf32>
    %8 = arith.maximumf %6, %7 : vector<16x768xf32>
    %9 = vector.extract_strided_slice %8 {offsets = [0, 0], sizes = [16, 512], strides = [1, 1]} : vector<16x768xf32> to vector<16x512xf32>
    %10 = vector.extract_strided_slice %8 {offsets = [0, 512], sizes = [16, 128], strides = [1, 1]} : vector<16x768xf32> to vector<16x128xf32>
    %11 = arith.truncf %10 : vector<16x128xf32> to vector<16x128xbf16>
    %12 = vector.extract_strided_slice %8 {offsets = [0, 640], sizes = [16, 128], strides = [1, 1]} : vector<16x768xf32> to vector<16x128xf32>
    %13 = arith.truncf %12 : vector<16x128xf32> to vector<16x128xbf16>
    %c1 = arith.constant 1 : index
    %c0_7 = arith.constant 0 : index
    %c0_8 = arith.constant 0 : index
    %14 = vector.load %arg10[%c1, %c0_7, %c0_8] : memref<6x16x16xbf16, #tpu.memory_space<vmem>>, vector<1x16x16xbf16>
    %15 = vector.shape_cast %14 : vector<1x16x16xbf16> to vector<16x16xbf16>
    %cst_9 = arith.constant dense<0.000000e+00> : vector<16x128xf32>
    %16 = tpu.matmul %15, %11, %cst_9 {dimension_numbers = #tpu.dot_dimension_numbers<[1], [0], [0], [1], [0, 0, 1, 1], [], []>} : vector<16x16xbf16>, vector<16x128xbf16>, vector<16x128xf32> -> vector<16x128xf32>
    %17 = arith.truncf %16 : vector<16x128xf32> to vector<16x128xbf16>
    %c2 = arith.constant 2 : index
    %c0_10 = arith.constant 0 : index
    %c0_11 = arith.constant 0 : index
    %18 = vector.load %arg10[%c2, %c0_10, %c0_11] : memref<6x16x16xbf16, #tpu.memory_space<vmem>>, vector<1x16x16xbf16>
    %19 = vector.shape_cast %18 : vector<1x16x16xbf16> to vector<16x16xbf16>
    %cst_12 = arith.constant dense<0.000000e+00> : vector<16x128xf32>
    %20 = tpu.matmul %19, %11, %cst_12 {dimension_numbers = #tpu.dot_dimension_numbers<[1], [0], [0], [1], [0, 0, 1, 1], [], []>} : vector<16x16xbf16>, vector<16x128xbf16>, vector<16x128xf32> -> vector<16x128xf32>
    %21 = arith.truncf %20 : vector<16x128xf32> to vector<16x128xbf16>
    %22 = tpu.concatenate %17, %11, %21 in 1 : vector<16x128xbf16>, vector<16x128xbf16>, vector<16x128xbf16> -> vector<16x384xbf16>
    %c0_13 = arith.constant 0 : index
    %c0_14 = arith.constant 0 : index
    %23 = vector.load %arg4[%c0_13, %c0_14] : memref<384x512xbf16, #tpu.memory_space<vmem>>, vector<384x512xbf16>
    %cst_15 = arith.constant dense<0.000000e+00> : vector<16x512xf32>
    %24 = tpu.matmul %22, %23, %cst_15 {dimension_numbers = #tpu.dot_dimension_numbers<[1], [0], [0], [1], [0, 0, 1, 1], [], []>} : vector<16x384xbf16>, vector<384x512xbf16>, vector<16x512xf32> -> vector<16x512xf32>
    %c0_16 = arith.constant 0 : index
    %c0_17 = arith.constant 0 : index
    %25 = vector.load %arg5[%c0_16, %c0_17] : memref<1x512xf32, #tpu.memory_space<vmem>>, vector<1x512xf32>
    %26 = vector.broadcast %25 : vector<1x512xf32> to vector<16x512xf32>
    %27 = arith.addf %24, %26 : vector<16x512xf32>
    %cst_18 = arith.constant 0.000000e+00 : f32
    %28 = vector.broadcast %cst_18 : f32 to vector<16x512xf32>
    %29 = arith.maximumf %27, %28 : vector<16x512xf32>
    %30 = arith.addf %9, %29 : vector<16x512xf32>
    %c0_19 = arith.constant 0 : index
    %c0_20 = arith.constant 0 : index
    %c0_21 = arith.constant 0 : index
    %31 = vector.load %arg10[%c0_19, %c0_20, %c0_21] : memref<6x16x16xbf16, #tpu.memory_space<vmem>>, vector<1x16x16xbf16>
    %32 = vector.shape_cast %31 : vector<1x16x16xbf16> to vector<16x16xbf16>
    %cst_22 = arith.constant dense<0.000000e+00> : vector<16x128xf32>
    %33 = tpu.matmul %32, %13, %cst_22 {dimension_numbers = #tpu.dot_dimension_numbers<[1], [0], [0], [1], [0, 0, 1, 1], [], []>} : vector<16x16xbf16>, vector<16x128xbf16>, vector<16x128xf32> -> vector<16x128xf32>
    %34 = arith.truncf %33 : vector<16x128xf32> to vector<16x128xbf16>
    %c1_23 = arith.constant 1 : index
    %c0_24 = arith.constant 0 : index
    %c0_25 = arith.constant 0 : index
    %35 = vector.load %arg10[%c1_23, %c0_24, %c0_25] : memref<6x16x16xbf16, #tpu.memory_space<vmem>>, vector<1x16x16xbf16>
    %36 = vector.shape_cast %35 : vector<1x16x16xbf16> to vector<16x16xbf16>
    %cst_26 = arith.constant dense<0.000000e+00> : vector<16x128xf32>
    %37 = tpu.matmul %36, %13, %cst_26 {dimension_numbers = #tpu.dot_dimension_numbers<[1], [0], [0], [1], [0, 0, 1, 1], [], []>} : vector<16x16xbf16>, vector<16x128xbf16>, vector<16x128xf32> -> vector<16x128xf32>
    %38 = arith.truncf %37 : vector<16x128xf32> to vector<16x128xbf16>
    %c2_27 = arith.constant 2 : index
    %c0_28 = arith.constant 0 : index
    %c0_29 = arith.constant 0 : index
    %39 = vector.load %arg10[%c2_27, %c0_28, %c0_29] : memref<6x16x16xbf16, #tpu.memory_space<vmem>>, vector<1x16x16xbf16>
    %40 = vector.shape_cast %39 : vector<1x16x16xbf16> to vector<16x16xbf16>
    %cst_30 = arith.constant dense<0.000000e+00> : vector<16x128xf32>
    %41 = tpu.matmul %40, %13, %cst_30 {dimension_numbers = #tpu.dot_dimension_numbers<[1], [0], [0], [1], [0, 0, 1, 1], [], []>} : vector<16x16xbf16>, vector<16x128xbf16>, vector<16x128xf32> -> vector<16x128xf32>
    %42 = arith.truncf %41 : vector<16x128xf32> to vector<16x128xbf16>
    %c3 = arith.constant 3 : index
    %c0_31 = arith.constant 0 : index
    %c0_32 = arith.constant 0 : index
    %43 = vector.load %arg10[%c3, %c0_31, %c0_32] : memref<6x16x16xbf16, #tpu.memory_space<vmem>>, vector<1x16x16xbf16>
    %44 = vector.shape_cast %43 : vector<1x16x16xbf16> to vector<16x16xbf16>
    %cst_33 = arith.constant dense<0.000000e+00> : vector<16x128xf32>
    %45 = tpu.matmul %44, %13, %cst_33 {dimension_numbers = #tpu.dot_dimension_numbers<[1], [0], [0], [1], [0, 0, 1, 1], [], []>} : vector<16x16xbf16>, vector<16x128xbf16>, vector<16x128xf32> -> vector<16x128xf32>
    %46 = arith.truncf %45 : vector<16x128xf32> to vector<16x128xbf16>
    %47 = tpu.concatenate %34, %38, %13, %42, %46 in 1 : vector<16x128xbf16>, vector<16x128xbf16>, vector<16x128xbf16>, vector<16x128xbf16>, vector<16x128xbf16> -> vector<16x640xbf16>
    %c0_34 = arith.constant 0 : index
    %c0_35 = arith.constant 0 : index
    %48 = vector.load %arg6[%c0_34, %c0_35] : memref<640x512xbf16, #tpu.memory_space<vmem>>, vector<640x512xbf16>
    %cst_36 = arith.constant dense<0.000000e+00> : vector<16x512xf32>
    %49 = tpu.matmul %47, %48, %cst_36 {dimension_numbers = #tpu.dot_dimension_numbers<[1], [0], [0], [1], [0, 0, 1, 1], [], []>} : vector<16x640xbf16>, vector<640x512xbf16>, vector<16x512xf32> -> vector<16x512xf32>
    %c0_37 = arith.constant 0 : index
    %c0_38 = arith.constant 0 : index
    %50 = vector.load %arg7[%c0_37, %c0_38] : memref<1x512xf32, #tpu.memory_space<vmem>>, vector<1x512xf32>
    %51 = vector.broadcast %50 : vector<1x512xf32> to vector<16x512xf32>
    %52 = arith.addf %49, %51 : vector<16x512xf32>
    %cst_39 = arith.constant 0.000000e+00 : f32
    %53 = vector.broadcast %cst_39 : f32 to vector<16x512xf32>
    %54 = arith.maximumf %52, %53 : vector<16x512xf32>
    %55 = arith.addf %30, %54 : vector<16x512xf32>
    %56 = arith.extf %1 : vector<16x64xbf16> to vector<16x64xf32>
    %c4 = arith.constant 4 : index
    %c0_40 = arith.constant 0 : index
    %c0_41 = arith.constant 0 : index
    %57 = vector.load %arg10[%c4, %c0_40, %c0_41] : memref<6x16x16xbf16, #tpu.memory_space<vmem>>, vector<1x16x16xbf16>
    %58 = vector.shape_cast %57 : vector<1x16x16xbf16> to vector<16x16xbf16>
    %cst_42 = arith.constant dense<0.000000e+00> : vector<16x64xf32>
    %59 = tpu.matmul %58, %1, %cst_42 {dimension_numbers = #tpu.dot_dimension_numbers<[1], [0], [0], [1], [0, 0, 1, 1], [], []>} : vector<16x16xbf16>, vector<16x64xbf16>, vector<16x64xf32> -> vector<16x64xf32>
    %c5 = arith.constant 5 : index
    %c0_43 = arith.constant 0 : index
    %c0_44 = arith.constant 0 : index
    %60 = vector.load %arg10[%c5, %c0_43, %c0_44] : memref<6x16x16xbf16, #tpu.memory_space<vmem>>, vector<1x16x16xbf16>
    %61 = vector.shape_cast %60 : vector<1x16x16xbf16> to vector<16x16xbf16>
    %cst_45 = arith.constant dense<0.000000e+00> : vector<16x64xf32>
    %62 = tpu.matmul %61, %1, %cst_45 {dimension_numbers = #tpu.dot_dimension_numbers<[1], [0], [0], [1], [0, 0, 1, 1], [], []>} : vector<16x16xbf16>, vector<16x64xbf16>, vector<16x64xf32> -> vector<16x64xf32>
    %63 = arith.maximumf %59, %62 : vector<16x64xf32>
    %64 = arith.maximumf %63, %56 : vector<16x64xf32>
    %65 = arith.truncf %64 : vector<16x64xf32> to vector<16x64xbf16>
    %c0_46 = arith.constant 0 : index
    %c0_47 = arith.constant 0 : index
    %c0_48 = arith.constant 0 : index
    %66 = vector.load %arg11[%c0_46, %c0_47, %c0_48] : memref<2x64x64xbf16, #tpu.memory_space<vmem>>, vector<1x64x64xbf16>
    %67 = vector.shape_cast %66 : vector<1x64x64xbf16> to vector<64x64xbf16>
    %cst_49 = arith.constant dense<0.000000e+00> : vector<16x64xf32>
    %68 = tpu.matmul %65, %67, %cst_49 {dimension_numbers = #tpu.dot_dimension_numbers<[1], [0], [0], [1], [0, 0, 1, 1], [], []>} : vector<16x64xbf16>, vector<64x64xbf16>, vector<16x64xf32> -> vector<16x64xf32>
    %c1_50 = arith.constant 1 : index
    %c0_51 = arith.constant 0 : index
    %c0_52 = arith.constant 0 : index
    %69 = vector.load %arg11[%c1_50, %c0_51, %c0_52] : memref<2x64x64xbf16, #tpu.memory_space<vmem>>, vector<1x64x64xbf16>
    %70 = vector.shape_cast %69 : vector<1x64x64xbf16> to vector<64x64xbf16>
    %cst_53 = arith.constant dense<0.000000e+00> : vector<16x64xf32>
    %71 = tpu.matmul %65, %70, %cst_53 {dimension_numbers = #tpu.dot_dimension_numbers<[1], [0], [0], [1], [0, 0, 1, 1], [], []>} : vector<16x64xbf16>, vector<64x64xbf16>, vector<16x64xf32> -> vector<16x64xf32>
    %72 = arith.maximumf %68, %71 : vector<16x64xf32>
    %73 = arith.maximumf %72, %64 : vector<16x64xf32>
    %74 = arith.truncf %73 : vector<16x64xf32> to vector<16x64xbf16>
    %c0_54 = arith.constant 0 : index
    %c0_55 = arith.constant 0 : index
    %75 = vector.load %arg8[%c0_54, %c0_55] : memref<64x512xbf16, #tpu.memory_space<vmem>>, vector<64x512xbf16>
    %cst_56 = arith.constant dense<0.000000e+00> : vector<16x512xf32>
    %76 = tpu.matmul %74, %75, %cst_56 {dimension_numbers = #tpu.dot_dimension_numbers<[1], [0], [0], [1], [0, 0, 1, 1], [], []>} : vector<16x64xbf16>, vector<64x512xbf16>, vector<16x512xf32> -> vector<16x512xf32>
    %c0_57 = arith.constant 0 : index
    %c0_58 = arith.constant 0 : index
    %77 = vector.load %arg9[%c0_57, %c0_58] : memref<1x512xf32, #tpu.memory_space<vmem>>, vector<1x512xf32>
    %78 = vector.broadcast %77 : vector<1x512xf32> to vector<16x512xf32>
    %79 = arith.addf %76, %78 : vector<16x512xf32>
    %cst_59 = arith.constant 0.000000e+00 : f32
    %80 = vector.broadcast %cst_59 : f32 to vector<16x512xf32>
    %81 = arith.maximumf %79, %80 : vector<16x512xf32>
    %82 = arith.addf %55, %81 : vector<16x512xf32>
    %83 = vector.shape_cast %82 : vector<16x512xf32> to vector<1x16x512xf32>
    %c0_60 = arith.constant 0 : index
    %c0_61 = arith.constant 0 : index
    %c0_62 = arith.constant 0 : index
    %84 = vector.load %arg12[%c0_60, %c0_61, %c0_62] : memref<1x16x512xf32, #tpu.memory_space<vmem>>, vector<1x16x512xf32>
    tpu.vector_store %arg12[%c0_60, %c0_61, %c0_62], %83 {strides = array<i32>} : memref<1x16x512xf32, #tpu.memory_space<vmem>>, vector<1x16x512xf32>,
    return
  }
  func.func @transform_0(%arg0: i32) -> (i32, i32, i32) {
    %c0_i32 = arith.constant 0 : i32
    %c0_i32_0 = arith.constant 0 : i32
    %c0_i32_1 = arith.constant 0 : i32
    return %arg0, %c0_i32, %c0_i32_0 : i32, i32, i32
  }
  func.func @transform_1(%arg0: i32) -> (i32, i32) {
    %c0_i32 = arith.constant 0 : i32
    %c0_i32_0 = arith.constant 0 : i32
    %c0_i32_1 = arith.constant 0 : i32
    return %c0_i32, %c0_i32_0 : i32, i32
  }
  func.func @transform_2(%arg0: i32) -> (i32, i32) {
    %c0_i32 = arith.constant 0 : i32
    %c0_i32_0 = arith.constant 0 : i32
    %c0_i32_1 = arith.constant 0 : i32
    return %c0_i32, %c0_i32_0 : i32, i32
  }
  func.func @transform_3(%arg0: i32) -> (i32, i32) {
    %c0_i32 = arith.constant 0 : i32
    %c0_i32_0 = arith.constant 0 : i32
    %c0_i32_1 = arith.constant 0 : i32
    return %c0_i32, %c0_i32_0 : i32, i32
  }
  func.func @transform_4(%arg0: i32) -> (i32, i32) {
    %c0_i32 = arith.constant 0 : i32
    %c0_i32_0 = arith.constant 0 : i32
    %c0_i32_1 = arith.constant 0 : i32
    return %c0_i32, %c0_i32_0 : i32, i32
  }
  func.func @transform_5(%arg0: i32) -> (i32, i32) {
    %c0_i32 = arith.constant 0 : i32
    %c0_i32_0 = arith.constant 0 : i32
    %c0_i32_1 = arith.constant 0 : i32
    return %c0_i32, %c0_i32_0 : i32, i32
  }
  func.func @transform_6(%arg0: i32) -> (i32, i32) {
    %c0_i32 = arith.constant 0 : i32
    %c0_i32_0 = arith.constant 0 : i32
    %c0_i32_1 = arith.constant 0 : i32
    return %c0_i32, %c0_i32_0 : i32, i32
  }
  func.func @transform_7(%arg0: i32) -> (i32, i32) {
    %c0_i32 = arith.constant 0 : i32
    %c0_i32_0 = arith.constant 0 : i32
    %c0_i32_1 = arith.constant 0 : i32
    return %c0_i32, %c0_i32_0 : i32, i32
  }
  func.func @transform_8(%arg0: i32) -> (i32, i32) {
    %c0_i32 = arith.constant 0 : i32
    %c0_i32_0 = arith.constant 0 : i32
    %c0_i32_1 = arith.constant 0 : i32
    return %c0_i32, %c0_i32_0 : i32, i32
  }
  func.func @transform_9(%arg0: i32) -> (i32, i32, i32) {
    %c0_i32 = arith.constant 0 : i32
    %c0_i32_0 = arith.constant 0 : i32
    %c0_i32_1 = arith.constant 0 : i32
    %c0_i32_2 = arith.constant 0 : i32
    return %c0_i32, %c0_i32_0, %c0_i32_1 : i32, i32, i32
  }
  func.func @transform_10(%arg0: i32) -> (i32, i32, i32) {
    %c0_i32 = arith.constant 0 : i32
    %c0_i32_0 = arith.constant 0 : i32
    %c0_i32_1 = arith.constant 0 : i32
    %c0_i32_2 = arith.constant 0 : i32
    return %c0_i32, %c0_i32_0, %c0_i32_1 : i32, i32, i32
  }
  func.func @transform_11(%arg0: i32) -> (i32, i32, i32) {
    %c0_i32 = arith.constant 0 : i32
    %c0_i32_0 = arith.constant 0 : i32
    %c0_i32_1 = arith.constant 0 : i32
    return %arg0, %c0_i32, %c0_i32_0 : i32, i32, i32
  }
}

</mosaic_0001>

<bundles_post_ra>
// kernel: tile.54
= control target key start
LH: loop header
LB: loop body
LE: loop exit
PB: predicated region body
PF: predicated region fallthrough
CT: control target
= control target key end

     0   :  { %s28_s0 = inlined_call_operand.vmem [shape: f32[32], index: 0, kind: input, shape index: {}]   ;;  %s29_s1 = inlined_call_operand.vmem [shape: f32[16,32], index: 1, kind: output, shape index: {}]  }
   0x1   :  { %v4_v0 = vld [vmem:[%s28_s0] ss:$0 sm:$0xff] }
   0x2   :  { %5 = vst [vmem:[%s29_s1] sm:$0xff] %v4_v0  ;;  %8 = vst [vmem:[%s29_s1 + $0x8] sm:$0xff] %v4_v0 }

// kernel: tile.35
= control target key start
LH: loop header
LB: loop body
LE: loop exit
PB: predicated region body
PF: predicated region fallthrough
CT: control target
= control target key end

     0   :  { %s28_s0 = inlined_call_operand.vmem [shape: f32[4], index: 0, kind: input, shape index: {}]   ;;  %s29_s1 = inlined_call_operand.vmem [shape: f32[16,4], index: 1, kind: output, shape index: {}]  }
   0x1   :  { %v4_v0 = vld [vmem:[%s28_s0] ss:$0 sm:$0xff] }
   0x2   :  { %5 = vst [vmem:[%s29_s1] sm:$0xff] %v4_v0  ;;  %8 = vst [vmem:[%s29_s1 + $0x8] sm:$0xff] %v4_v0 }

// kernel: tile.55
= control target key start
LH: loop header
LB: loop body
LE: loop exit
PB: predicated region body
PF: predicated region fallthrough
CT: control target
= control target key end

     0   :  { %s62_s8 = smov 96   ;;  %vm3_vm0 = vcmask 261120   ;;  %s64_s15 = smov 64   ;;  %vm9_vm1 = vcmask 1048320   ;;  %vm15_vm2 = vcmask 785920   ;;  %vm21_vm3 = vcmask 523520   ;;  %s99_s0 = inlined_call_operand.vmem [shape: f32[16,32], index: 0, kind: input, shape index: {}]   ;;  %s100_s1 = inlined_call_operand.vmem [shape: f32[1,512], index: 1, kind: output, shape index: {}]  }
   0x1   :  { %v53_v0 = vld [vmem:[%s99_s0 + $0x3] ss:$4 sm:$0xf]   ;;  %v54_v1 = vld [vmem:[%s99_s0 + $0x2] ss:$4 sm:$0xf]  }
   0x2   :  { %7 = vrot.lane.b32.xlu0 %v53_v0, %s62_s8  ;;  %v55_v2 = vld [vmem:[%s99_s0 + $0x1] ss:$4 sm:$0xf]   ;;  %v2_v3 = vld [vmem:[%s99_s0] ss:$4 sm:$0xf]  }
   0x3   :  { %s63_s0 = smov 32   ;;  %4 = vst.msk [vmem:[#allocation0] ss:$8 sm:$0xf] %vm3_vm0, %v2_v3  }
   0x4   :  { %19 = vrot.lane.b32.xlu1 %v55_v2, %s63_s0 }
   0x6   :  { %13 = vrot.lane.b32.xlu0 %v54_v1, %s64_s15 }
  0x74   :  { %v8_v4 = vpop.permute.xlu0 %7  }
  0x75   :  { %10 = vst.msk [vmem:[#allocation0] ss:$8 sm:$0xf] %vm9_vm1, %v8_v4  }
  0x76   :  { %v20_v5 = vpop.permute.xlu1 %19  }
  0x78   :  { %v14_v6 = vpop.permute.xlu0 %13  }
  0x79   :  { %16 = vst.msk [vmem:[#allocation0] ss:$8 sm:$0xf] %vm15_vm2, %v14_v6  }
  0x7a   :  { %22 = vst.msk [vmem:[#allocation0] ss:$8 sm:$0xf] %vm21_vm3, %v20_v5  }
  0x81   :  { %v27_v7 = vld [vmem:[#allocation0] sm:$0x1]  ;;  %v32_v8 = vld [vmem:[#allocation0 + $0x8] sm:$0x1]  ;;  %v38_v9 = vld [vmem:[#allocation0 + $0x10] sm:$0x1] }
  0x82   :  { %30 = vst [vmem:[%s100_s1] sm:$0x1] %v27_v7  ;;  %56 = vst [vmem:[%s100_s1 + $0x1] sm:$0x1] %v32_v8  ;;  %v45_v10 = vld [vmem:[#allocation0 + $0x18] sm:$0x1] }
  0x83   :  { %57 = vst [vmem:[%s100_s1 + $0x2] sm:$0x1] %v38_v9  ;;  %58 = vst [vmem:[%s100_s1 + $0x3] sm:$0x1] %v45_v10 }

// kernel: tile.36
= control target key start
LH: loop header
LB: loop body
LE: loop exit
PB: predicated region body
PF: predicated region fallthrough
CT: control target
= control target key end

     0   :  { %s133_s10 = smov 60   ;;  %s134_s11 = smov 52   ;;  %vm3_vm0 = vcmask 31744   ;;  %vm9_vm1 = vcmask 523744   ;;  %vm15_vm2 = vcmask 490944   ;;  %vm21_vm3 = vcmask 458144   ;;  %s209_s0 = inlined_call_operand.vmem [shape: f32[16,4], index: 0, kind: input, shape index: {}]   ;;  %s210_s1 = inlined_call_operand.vmem [shape: f32[1,64], index: 1, kind: output, shape index: {}]  }
   0x1   :  { %v103_v0 = vld [vmem:[%s209_s0 + $0xf] sm:$0x1]   ;;  %v105_v1 = vld [vmem:[%s209_s0 + $0xd] sm:$0x1]   ;;  %v104_v2 = vld [vmem:[%s209_s0 + $0xe] sm:$0x1]  }
   0x2   :  { %7 = vrot.lane.b32.xlu0 %v103_v0, %s133_s10  ;;  %19 = vrot.lane.b32.xlu1 %v105_v1, %s134_s11  ;;  %v106_v3 = vld [vmem:[%s209_s0 + $0xc] sm:$0x1]   ;;  %s135_s16 = smov 56   ;;  %s136_s17 = smov 48   ;;  %v107_v4 = vld [vmem:[%s209_s0 + $0xb] sm:$0x1]  }
   0x3   :  { %v108_v5 = vld [vmem:[%s209_s0 + $0xa] sm:$0x1]   ;;  %v2_v6 = vld [vmem:[%s209_s0] sm:$0x1]   ;;  %s137_s24 = smov 44   ;;  %s138_s25 = smov 40  }
   0x4   :  { %4 = vst.msk [vmem:[#allocation0] sm:$0x1] %vm3_vm0, %v2_v6   ;;  %v109_v7 = vld [vmem:[%s209_s0 + $0x9] sm:$0x1]   ;;  %v110_v8 = vld [vmem:[%s209_s0 + $0x8] sm:$0x1]  }
   0x5   :  { %s139_s30 = smov 36   ;;  %s140_s2 = smov 32   ;;  %v111_v9 = vld [vmem:[%s209_s0 + $0x7] sm:$0x1]   ;;  %v112_v10 = vld [vmem:[%s209_s0 + $0x6] sm:$0x1]  }
   0x6   :  { %13 = vrot.lane.b32.xlu0 %v104_v2, %s135_s16  ;;  %25 = vrot.lane.b32.xlu1 %v106_v3, %s136_s17  ;;  %s141_s7 = smov 28   ;;  %s142_s8 = smov 24   ;;  %v113_v11 = vld [vmem:[%s209_s0 + $0x5] sm:$0x1]   ;;  %v114_v12 = vld [vmem:[%s209_s0 + $0x4] sm:$0x1]  }
   0x7   :  { %s143_s13 = smov 20   ;;  %s144_s14 = smov 16   ;;  %v115_v13 = vld [vmem:[%s209_s0 + $0x3] sm:$0x1]   ;;  %v116_v14 = vld [vmem:[%s209_s0 + $0x2] sm:$0x1]  }
   0x8   :  { %s145_s19 = smov 12   ;;  %s146_s20 = smov 8   ;;  %v117_v15 = vld [vmem:[%s209_s0 + $0x1] sm:$0x1]   ;;  %vm27_vm4 = vcmask 425344   ;;  %vm33_vm5 = vcmask 392544  }
   0x9   :  { %s147_s0 = smov 4   ;;  %vm39_vm6 = vcmask 359744   ;;  %vm45_vm7 = vcmask 326944   ;;  %vm51_vm8 = vcmask 294144   ;;  %vm57_vm9 = vcmask 261344  }
   0xa   :  { %31 = vrot.lane.b32.xlu0 %v107_v4, %s137_s24  ;;  %37 = vrot.lane.b32.xlu1 %v108_v5, %s138_s25  ;;  %vm63_vm10 = vcmask 228544   ;;  %vm69_vm11 = vcmask 195744   ;;  %vm75_vm12 = vcmask 162944   ;;  %vm81_vm13 = vcmask 130144  }
   0xb   :  { %vm87_vm14 = vcmask 97344   ;;  %vm93_vm15 = vcmask 64544  }
   0xe   :  { %43 = vrot.lane.b32.xlu0 %v109_v7, %s139_s30  ;;  %49 = vrot.lane.b32.xlu1 %v110_v8, %s140_s2 }
  0x12   :  { %55 = vrot.lane.b32.xlu0 %v111_v9, %s141_s7  ;;  %61 = vrot.lane.b32.xlu1 %v112_v10, %s142_s8 }
  0x16   :  { %67 = vrot.lane.b32.xlu0 %v113_v11, %s143_s13  ;;  %73 = vrot.lane.b32.xlu1 %v114_v12, %s144_s14 }
  0x1a   :  { %79 = vrot.lane.b32.xlu0 %v115_v13, %s145_s19  ;;  %85 = vrot.lane.b32.xlu1 %v116_v14, %s146_s20 }
  0x1e   :  { %91 = vrot.lane.b32.xlu0 %v117_v15, %s147_s0 }
  0x74   :  { %v8_v16 = vpop.permute.xlu0 %7   ;;  %v20_v17 = vpop.permute.xlu1 %19  }
  0x75   :  { %10 = vst.msk [vmem:[#allocation0] sm:$0x1] %vm9_vm1, %v8_v16  }
  0x78   :  { %v14_v18 = vpop.permute.xlu0 %13   ;;  %v26_v19 = vpop.permute.xlu1 %25  }
  0x79   :  { %16 = vst.msk [vmem:[#allocation0] sm:$0x1] %vm15_vm2, %v14_v18  }
  0x7a   :  { %22 = vst.msk [vmem:[#allocation0] sm:$0x1] %vm21_vm3, %v20_v17  }
  0x7b   :  { %28 = vst.msk [vmem:[#allocation0] sm:$0x1] %vm27_vm4, %v26_v19  }
  0x7c   :  { %v32_v20 = vpop.permute.xlu0 %31   ;;  %v38_v21 = vpop.permute.xlu1 %37  }
  0x7d   :  { %34 = vst.msk [vmem:[#allocation0] sm:$0x1] %vm33_vm5, %v32_v20  }
  0x7e   :  { %40 = vst.msk [vmem:[#allocation0] sm:$0x1] %vm39_vm6, %v38_v21  }
  0x80   :  { %v44_v22 = vpop.permute.xlu0 %43   ;;  %v50_v23 = vpop.permute.xlu1 %49  }
  0x81   :  { %46 = vst.msk [vmem:[#allocation0] sm:$0x1] %vm45_vm7, %v44_v22  }
  0x82   :  { %52 = vst.msk [vmem:[#allocation0] sm:$0x1] %vm51_vm8, %v50_v23  }
  0x84   :  { %v56_v24 = vpop.permute.xlu0 %55   ;;  %v62_v25 = vpop.permute.xlu1 %61  }
  0x85   :  { %58 = vst.msk [vmem:[#allocation0] sm:$0x1] %vm57_vm9, %v56_v24  }
  0x86   :  { %64 = vst.msk [vmem:[#allocation0] sm:$0x1] %vm63_vm10, %v62_v25  }
  0x88   :  { %v68_v26 = vpop.permute.xlu0 %67   ;;  %v74_v27 = vpop.permute.xlu1 %73  }
  0x89   :  { %70 = vst.msk [vmem:[#allocation0] sm:$0x1] %vm69_vm11, %v68_v26  }
  0x8a   :  { %76 = vst.msk [vmem:[#allocation0] sm:$0x1] %vm75_vm12, %v74_v27  }
  0x8c   :  { %v80_v28 = vpop.permute.xlu0 %79   ;;  %v86_v29 = vpop.permute.xlu1 %85  }
  0x8d   :  { %82 = vst.msk [vmem:[#allocation0] sm:$0x1] %vm81_vm13, %v80_v28  }
  0x8e   :  { %88 = vst.msk [vmem:[#allocation0] sm:$0x1] %vm87_vm14, %v86_v29  }
  0x90   :  { %v92_v30 = vpop.permute.xlu0 %91  }
  0x91   :  { %94 = vst.msk [vmem:[#allocation0] sm:$0x1] %vm93_vm15, %v92_v30  }
  0x98   :  { %v99_v31 = vld [vmem:[#allocation0] sm:$0x1] }
  0x99   :  { %102 = vst [vmem:[%s210_s1] sm:$0x1] %v99_v31 }

// kernel: inception_block.1
= control target key start
LH: loop header
LB: loop body
LE: loop exit
PB: predicated region body
PF: predicated region fallthrough
CT: control target
= control target key end

     0   :  { %s4607_s17 = smov 0   ;;  %s5816_s0 = inlined_call_operand.vmem [shape: bf16[2,16,64], index: 0, kind: input, shape index: {}]   ;;  %s5817_s1 = inlined_call_operand.vmem [shape: bf16[64,768], index: 1, kind: input, shape index: {}]   ;;  %s5818_s2 = inlined_call_operand.vmem [shape: f32[1,768], index: 2, kind: input, shape index: {}]   ;;  %s5819_s3 = inlined_call_operand.vmem [shape: bf16[384,512], index: 3, kind: input, shape index: {}]   ;;  %s5820_s4 = inlined_call_operand.vmem [shape: f32[1,512], index: 4, kind: input, shape index: {}]   ;;  %s5821_s5 = inlined_call_operand.vmem [shape: bf16[640,512], index: 5, kind: input, shape index: {}]   ;;  %s5822_s6 = inlined_call_operand.vmem [shape: f32[1,512], index: 6, kind: input, shape index: {}]   ;;  %s5823_s7 = inlined_call_operand.vmem [shape: bf16[64,512], index: 7, kind: input, shape index: {}]   ;;  %s5824_s8 = inlined_call_operand.vmem [shape: f32[1,512], index: 8, kind: input, shape index: {}]   ;;  %s5825_s9 = inlined_call_operand.vmem [shape: bf16[6,16,16], index: 9, kind: input, shape index: {}]   ;;  %s5826_s10 = inlined_call_operand.vmem [shape: bf16[2,64,64], index: 10, kind: input, shape index: {}]   ;;  %s5827_s11 = inlined_call_operand.vmem [shape: f32[2,16,512], index: 11, kind: output, shape index: {}]  }
   0x1 LB: > { %s3609_s18 = sadd.s32 4294967295, %s4542_s17   ;;  %p3613_p0 = scmp.ge.s32.totalorder %s4542_s17, 1  ;;  %s4542_s17 = sphi %s4607_s17, %s21_s17  }
   0x2   : > { %p337_p1 = scmp.lt.s32.totalorder %s4542_s17, 3 }
   0x4   : > { %p338_p2 = pnand %p3613_p0, %p337_p1 }
   0x5   : > { %p377_p3 = scmp.lt.s32.totalorder (!%p338_p2), %s3609_s18, 1 }
   0x6   : > { %341 = sbr.rel (%p338_p2) target bundleno = 1447 (0x5a7), region = 64 }
   0xb   : > { %v4075_v0 = vld [vmem:[%s5817_s1 + $0x94] ss:$24 sps:$4 sm:$0xff]   ;;  %v4077_v1 = vld [vmem:[%s5817_s1 + $0x90] ss:$24 sps:$4 sm:$0xff]   ;;  %v4544_v2 = vmov 0   ;;  %s5829_s18 = smov (!%p377_p3, %s3609_s18), 1  ;;  %v416_v58 = vlaneseq }
   0xc   : > { %607 = vmatprep.mubr.bf16.mxu0 %v4544_v2  ;;  %650 = vmatprep.mubr.bf16.mxu1 %v4544_v2  ;;  %v4078_v3 = vld [vmem:[%s5817_s1 + $0x64] ss:$24 sps:$4 sm:$0xff]   ;;  %v4080_v4 = vld [vmem:[%s5817_s1 + $0x60] ss:$24 sps:$4 sm:$0xff]   ;;  %v4081_v5 = vld [vmem:[%s5817_s1 + $0x34] ss:$24 sps:$4 sm:$0xff]  }
   0xd   : > { %583 = vmatprep.subr.bf16.mxu0 %v4075_v0  ;;  %s3964_s29 = sshll.u32 %s5829_s18, 3  ;;  %v4083_v6 = vld [vmem:[%s5817_s1 + $0x30] ss:$24 sps:$4 sm:$0xff]   ;;  %v4084_v7 = vld [vmem:[%s5817_s1 + $0x4] ss:$24 sps:$4 sm:$0xff]   ;;  %vm571_vm0 = vcmask 523264  }
   0xe   : > { %584 = vmatpush1.bf16.msra.mxu0 %v4077_v1  ;;  %s4641_s15 = scalar_lea.vmem %s5816_s0, %s3964_s29  ;;  %v4086_v8 = vld [vmem:[%s5817_s1] ss:$24 sps:$4 sm:$0xff]   ;;  %v4090_v10 = vld [vmem:[%s5817_s1 + $0xa4] ss:$24 sps:$4 sm:$0xff]   ;;  %v4093_v12 = vld [vmem:[%s5817_s1 + $0x74] ss:$24 sps:$4 sm:$0xff]  }
   0xf   : > { %585 = vmatprep.subr.bf16.mxu0 %v4078_v3  ;;  %v4650_v9 = vld [vmem:[%s4641_s15] sm:$0xff]   ;;  %v4091_v13 = vld [vmem:[%s5817_s1 + $0x70] ss:$24 sps:$4 sm:$0xff]   ;;  %v4099_v16 = vld [vmem:[%s5817_s1 + $0x14] ss:$24 sps:$4 sm:$0xff]   ;;  %v4545_v26 = vmov 0.0  }
  0x10   : > { %v4088_v11 = vld [vmem:[%s5817_s1 + $0xa0] ss:$24 sps:$4 sm:$0xff]   ;;  %v4096_v14 = vld [vmem:[%s5817_s1 + $0x44] ss:$24 sps:$4 sm:$0xff]   ;;  %v4097_v17 = vld [vmem:[%s5817_s1 + $0x10] ss:$24 sps:$4 sm:$0xff]  }
  0x11   : > { %v4094_v15 = vld [vmem:[%s5817_s1 + $0x40] ss:$24 sps:$4 sm:$0xff]   ;;  %v4100_v18 = vld [vmem:[%s5817_s1 + $0x9c] ss:$24 sps:$4 sm:$0xff]   ;;  %v4103_v20 = vld [vmem:[%s5817_s1 + $0x6c] ss:$24 sps:$4 sm:$0xff]  }
  0x12   : > { %586 = vmatpush1.bf16.msra.mxu0 %v4080_v4  ;;  %v4102_v19 = vld [vmem:[%s5817_s1 + $0x98] ss:$24 sps:$4 sm:$0xff]   ;;  %626 = vmatprep.subr.bf16.mxu1 %v4100_v18  ;;  %v4105_v21 = vld [vmem:[%s5817_s1 + $0x68] ss:$24 sps:$4 sm:$0xff]   ;;  %v4106_v22 = vld [vmem:[%s5817_s1 + $0x3c] ss:$24 sps:$4 sm:$0xff]  }
  0x13   : > { %587 = vmatprep.subr.bf16.mxu0 %v4081_v5  ;;  %627 = vmatpush1.bf16.msra.mxu1 %v4102_v19  ;;  %v4108_v23 = vld [vmem:[%s5817_s1 + $0x38] ss:$24 sps:$4 sm:$0xff]   ;;  %v4109_v24 = vld [vmem:[%s5817_s1 + $0xc] ss:$24 sps:$4 sm:$0xff]   ;;  %v4111_v25 = vld [vmem:[%s5817_s1 + $0x8] ss:$24 sps:$4 sm:$0xff]  }
  0x14   : > { %628 = vmatprep.subr.bf16.mxu1 %v4103_v20  ;;  %vm4546_vm1 = vmmov 0   ;;  %v4114_v27 = vld [vmem:[%s5819_s3 + $0xe0] ss:$16 sps:$4 sm:$0xff]   ;;  %v4116_v28 = vld [vmem:[%s5819_s3 + $0xe4] ss:$16 sps:$4 sm:$0xff]   ;;  %v4804_v60 = vshrl.u32 %v416_v58, 7 }
  0x15   : > { %v4119_v29 = vld [vmem:[%s5819_s3 + $0xc4] ss:$16 sps:$4 sm:$0xff]   ;;  %v4117_v30 = vld [vmem:[%s5819_s3 + $0xc0] ss:$16 sps:$4 sm:$0xff]   ;;  %vm726_vm2 = vcmask 130048   ;;  %s3965_s24 = sshll.u32 %s5829_s18, 6 }
  0x16   : > { %588 = vmatpush1.bf16.msra.mxu0 %v4083_v6  ;;  %v4122_v31 = vld [vmem:[%s5819_s3 + $0xa4] ss:$16 sps:$4 sm:$0xff]   ;;  %v4120_v32 = vld [vmem:[%s5819_s3 + $0xa0] ss:$16 sps:$4 sm:$0xff]   ;;  %v434_v62 = vsub.s32 4, %v4804_v60  ;;  %s386_s27 = scalar_lea.vmem %s5827_s11, %s3965_s24 }
  0x17   : > { %589 = vmatprep.subr.bf16.mxu0 %v4084_v7  ;;  %629 = vmatpush1.bf16.msra.mxu1 %v4105_v21  ;;  %v4125_v33 = vld [vmem:[%s5819_s3 + $0x84] ss:$16 sps:$4 sm:$0xff]   ;;  %v4123_v34 = vld [vmem:[%s5819_s3 + $0x80] ss:$16 sps:$4 sm:$0xff]   ;;  %v4198_v58 = vld [vmem:[%s5819_s3 + $0xc8] ss:$16 sps:$4 sm:$0xff]  }
  0x18   : > { %630 = vmatprep.subr.bf16.mxu1 %v4106_v22  ;;  %v4128_v35 = vld [vmem:[%s5819_s3 + $0x64] ss:$16 sps:$4 sm:$0xff]   ;;  %v4126_v36 = vld [vmem:[%s5819_s3 + $0x60] ss:$16 sps:$4 sm:$0xff]  }
  0x19   : > { %v4131_v37 = vld [vmem:[%s5819_s3 + $0x44] ss:$16 sps:$4 sm:$0xff]   ;;  %v4129_v38 = vld [vmem:[%s5819_s3 + $0x40] ss:$16 sps:$4 sm:$0xff]  }
  0x1a   : > { %590 = vmatpush1.bf16.msra.mxu0 %v4086_v8  ;;  %v4134_v39 = vld [vmem:[%s5819_s3 + $0x24] ss:$16 sps:$4 sm:$0xff]   ;;  %v4132_v40 = vld [vmem:[%s5819_s3 + $0x20] ss:$16 sps:$4 sm:$0xff]  }
  0x1b   : > { %669 = vmatprep.subr.bf16.mxu0 %v4090_v10  ;;  %631 = vmatpush1.bf16.msra.mxu1 %v4108_v23  ;;  %v4137_v41 = vld [vmem:[%s5819_s3 + $0x4] ss:$16 sps:$4 sm:$0xff]   ;;  %v4135_v42 = vld [vmem:[%s5819_s3] ss:$16 sps:$4 sm:$0xff]  }
  0x1c   : > { %632 = vmatprep.subr.bf16.mxu1 %v4109_v24  ;;  %v4140_v43 = vld [vmem:[%s5819_s3 + $0x1e4] ss:$16 sps:$4 sm:$0xff]   ;;  %v4138_v44 = vld [vmem:[%s5819_s3 + $0x1e0] ss:$16 sps:$4 sm:$0xff]  }
  0x1d   : > { %3643 = vmatmul.mubr.msk.bf16.vlgmr.msra.gmra.mxu0 %vm571_vm0, %v4650_v9  ;;  %v4143_v45 = vld [vmem:[%s5819_s3 + $0x1c4] ss:$16 sps:$4 sm:$0xff]   ;;  %v4141_v46 = vld [vmem:[%s5819_s3 + $0x1c0] ss:$16 sps:$4 sm:$0xff]  }
  0x1e   : > { %670 = vmatpush1.bf16.msra.mxu0 %v4088_v11  ;;  %693 = vmatprep.mubr.bf16.mxu0 %v4544_v2  ;;  %v4146_v47 = vld [vmem:[%s5819_s3 + $0x1a4] ss:$16 sps:$4 sm:$0xff]   ;;  %v4144_v48 = vld [vmem:[%s5819_s3 + $0x1a0] ss:$16 sps:$4 sm:$0xff]  }
  0x1f   : > { %671 = vmatprep.subr.bf16.mxu0 %v4093_v12  ;;  %633 = vmatpush1.bf16.msra.mxu1 %v4111_v25  ;;  %v4152_v49 = vld [vmem:[%s5819_s3 + $0x184] ss:$16 sps:$4 sm:$0xff]   ;;  %v4150_v50 = vld [vmem:[%s5819_s3 + $0x180] ss:$16 sps:$4 sm:$0xff]   ;;  %v4824_v12 = vld [vmem:[%s5825_s9 + $0x8] sm:$0xff]  }
  0x20   : > { %3992 = vmatprep.subr.bf16.mxu1 %v4545_v26  ;;  %v4158_v51 = vld [vmem:[%s5819_s3 + $0x164] ss:$16 sps:$4 sm:$0xff]   ;;  %v4156_v52 = vld [vmem:[%s5819_s3 + $0x160] ss:$16 sps:$4 sm:$0xff]  }
  0x21   : > { %v4164_v53 = vld [vmem:[%s5819_s3 + $0x144] ss:$16 sps:$4 sm:$0xff]   ;;  %v4162_v54 = vld [vmem:[%s5819_s3 + $0x140] ss:$16 sps:$4 sm:$0xff]  }
  0x22   : > { %672 = vmatpush1.bf16.msra.mxu0 %v4091_v13  ;;  %3644 = vmatmul.mubr.msk.bf16.vlgmr.msra.gmra.mxu1 %vm571_vm0, %v4650_v9  ;;  %v4170_v55 = vld [vmem:[%s5819_s3 + $0x124] ss:$16 sps:$4 sm:$0xff]   ;;  %v4168_v56 = vld [vmem:[%s5819_s3 + $0x120] ss:$16 sps:$4 sm:$0xff]  }
  0x23   : > { %673 = vmatprep.subr.bf16.mxu0 %v4096_v14  ;;  %3994 = vmatprep.mubr.msk.bf16.mxu1 %vm4546_vm1, %v4545_v26  ;;  %v4812_v63 = vld [vmem:[%s5818_s2] sm:$0x3f]  ;;  %v4840_v14 = vld [vmem:[%s5825_s9 + $0x10] sm:$0xff]  }
  0x24   : > { %v435_v1 = vrot.slane %v4812_v63, %v434_v62  ;;  %v4149_v13 = vld [vmem:[%s5819_s3 + $0x2e4] ss:$16 sps:$4 sm:$0xff]   ;;  %v4159_v19 = vld [vmem:[%s5819_s3 + $0x2a0] ss:$16 sps:$4 sm:$0xff]   ;;  %v4201_v62 = vld [vmem:[%s5819_s3 + $0x288] ss:$16 sps:$4 sm:$0xff]  }
  0x25   : > { %v4161_v18 = vld [vmem:[%s5819_s3 + $0x2a4] ss:$16 sps:$4 sm:$0xff]   ;;  %v4165_v21 = vld [vmem:[%s5819_s3 + $0x280] ss:$16 sps:$4 sm:$0xff]  }
  0x26   : > { %674 = vmatpush1.bf16.msra.mxu0 %v4094_v15  ;;  %v4147_v15 = vld [vmem:[%s5819_s3 + $0x2e0] ss:$16 sps:$4 sm:$0xff]   ;;  %v4167_v20 = vld [vmem:[%s5819_s3 + $0x284] ss:$16 sps:$4 sm:$0xff]  }
  0x27   : > { %675 = vmatprep.subr.bf16.mxu0 %v4099_v16  ;;  %v4155_v16 = vld [vmem:[%s5819_s3 + $0x2c4] ss:$16 sps:$4 sm:$0xff]   ;;  %v4171_v23 = vld [vmem:[%s5819_s3 + $0x260] ss:$16 sps:$4 sm:$0xff]  }
  0x28   : > { %v4173_v22 = vld [vmem:[%s5819_s3 + $0x264] ss:$16 sps:$4 sm:$0xff]  }
  0x29   : > { %v4176_v24 = vld [vmem:[%s5819_s3 + $0x104] ss:$16 sps:$4 sm:$0xff]  }
  0x2a   : > { %676 = vmatpush1.bf16.msra.mxu0 %v4097_v17  ;;  %v4153_v17 = vld [vmem:[%s5819_s3 + $0x2c0] ss:$16 sps:$4 sm:$0xff]   ;;  %v4179_v25 = vld [vmem:[%s5819_s3 + $0x244] ss:$16 sps:$4 sm:$0xff]  }
  0x2b   : > { %1423 = vmatprep.subr.bf16.mxu0 %v4116_v28  ;;  %v4177_v28 = vld [vmem:[%s5819_s3 + $0x240] ss:$16 sps:$4 sm:$0xff]  }
  0x2d   : > { %3645 = vmatmul.mubr.msk.bf16.vlgmr.msra.gmra.mxu0 %vm571_vm0, %v4650_v9 }
  0x2e   : > { %1424 = vmatpush1.bf16.msra.mxu0 %v4114_v27  ;;  %v4174_v27 = vld [vmem:[%s5819_s3 + $0x100] ss:$16 sps:$4 sm:$0xff]  }
  0x2f   : > { %1425 = vmatprep.subr.bf16.mxu0 %v4119_v29  ;;  %v4182_v29 = vld [vmem:[%s5819_s3 + $0x224] ss:$16 sps:$4 sm:$0xff]  }
  0x32   : > { %1426 = vmatpush1.bf16.msra.mxu0 %v4117_v30  ;;  %v4185_v30 = vld [vmem:[%s5819_s3 + $0x2ec] ss:$16 sps:$4 sm:$0xff]  }
  0x33   : > { %1427 = vmatprep.subr.bf16.mxu0 %v4122_v31  ;;  %v4180_v31 = vld [vmem:[%s5819_s3 + $0x220] ss:$16 sps:$4 sm:$0xff]  }
  0x36   : > { %1428 = vmatpush1.bf16.msra.mxu0 %v4120_v32  ;;  %v4188_v32 = vld [vmem:[%s5819_s3 + $0x204] ss:$16 sps:$4 sm:$0xff]  }
  0x37   : > { %1429 = vmatprep.subr.bf16.mxu0 %v4125_v33  ;;  %v4186_v33 = vld [vmem:[%s5819_s3 + $0x200] ss:$16 sps:$4 sm:$0xff]  }
  0x3a   : > { %1430 = vmatpush1.bf16.msra.mxu0 %v4123_v34  ;;  %v4194_v34 = vld [vmem:[%s5819_s3 + $0xec] ss:$16 sps:$4 sm:$0xff]  }
  0x3b   : > { %1431 = vmatprep.subr.bf16.mxu0 %v4128_v35 }
  0x3e   : > { %1432 = vmatpush1.bf16.msra.mxu0 %v4126_v36 }
  0x3f   : > { %1433 = vmatprep.subr.bf16.mxu0 %v4131_v37 }
  0x42   : > { %1434 = vmatpush1.bf16.msra.mxu0 %v4129_v38 }
  0x43   : > { %1435 = vmatprep.subr.bf16.mxu0 %v4134_v39 }
  0x46   : > { %1436 = vmatpush1.bf16.msra.mxu0 %v4132_v40 }
  0x47   : > { %1437 = vmatprep.subr.bf16.mxu0 %v4137_v41 }
  0x4a   : > { %1438 = vmatpush1.bf16.msra.mxu0 %v4135_v42  ;;  %v4183_v42 = vld [vmem:[%s5819_s3 + $0x2e8] ss:$16 sps:$4 sm:$0xff]  }
  0x4b   : > { %1439 = vmatprep.subr.bf16.mxu0 %v4140_v43 }
  0x4e   : > { %1440 = vmatpush2.bf16.msra.mxu0 %v4138_v44  ;;  %v4191_v44 = vld [vmem:[%s5819_s3 + $0x2cc] ss:$16 sps:$4 sm:$0xff]  }
  0x4f   : > { %1441 = vmatprep.subr.bf16.mxu0 %v4143_v45 }
  0x52   : > { %1442 = vmatpush2.bf16.msra.mxu0 %v4141_v46 }
  0x53   : > { %1443 = vmatprep.subr.bf16.mxu0 %v4146_v47  ;;  %v4189_v47 = vld [vmem:[%s5819_s3 + $0x2c8] ss:$16 sps:$4 sm:$0xff]  }
  0x56   : > { %1444 = vmatpush2.bf16.msra.mxu0 %v4144_v48  ;;  %v4197_v48 = vld [vmem:[%s5819_s3 + $0x2ac] ss:$16 sps:$4 sm:$0xff]  }
  0x57   : > { %1445 = vmatprep.subr.bf16.mxu0 %v4152_v49 }
  0x5a   : > { %1446 = vmatpush2.bf16.msra.mxu0 %v4150_v50 }
  0x5b   : > { %1447 = vmatprep.subr.bf16.mxu0 %v4158_v51  ;;  %v4192_v51 = vld [vmem:[%s5819_s3 + $0xe8] ss:$16 sps:$4 sm:$0xff]  }
  0x5e   : > { %1448 = vmatpush2.bf16.msra.mxu0 %v4156_v52  ;;  %v4195_v52 = vld [vmem:[%s5819_s3 + $0x2a8] ss:$16 sps:$4 sm:$0xff]  }
  0x5f   : > { %1449 = vmatprep.subr.bf16.mxu0 %v4164_v53 }
  0x62   : > { %1450 = vmatpush2.bf16.msra.mxu0 %v4162_v54  ;;  %v4200_v54 = vld [vmem:[%s5819_s3 + $0xcc] ss:$16 sps:$4 sm:$0xff]  }
  0x63   : > { %1451 = vmatprep.subr.bf16.mxu0 %v4170_v55 }
  0x66   : > { %1452 = vmatpush2.bf16.msra.mxu0 %v4168_v56  ;;  %v4203_v56 = vld [vmem:[%s5819_s3 + $0x28c] ss:$16 sps:$4 sm:$0xff]  }
  0x67   : > { %1453 = vmatprep.subr.bf16.mxu0 %v4176_v24 }
  0x6a   : > { %1454 = vmatpush2.bf16.msra.mxu0 %v4174_v27  ;;  %v4225_v27 = vld [vmem:[%s5819_s3 + $0x208] ss:$16 sps:$4 sm:$0xff]  }
  0x6b   : > { %1552 = vmatprep.subr.bf16.mxu0 %v4185_v30 }
  0xdd   : > { %v4800_v57 = vpop.f32.mrf.mxu0 }
  0xdf   : > { %v4802_v59 = vpop.f32.mrf.mxu0 }
  0xe1   : > { %v4806_v61 = vpop.f32.mrf.mxu0 }
  0xe2   : > { %v4902_v35 = vpop.f32.mrf.mxu1 }
  0xe3   : > { %v4814_v0 = vpop.f32.mrf.mxu0 }
  0xe4   : > { %v4904_v36 = vpop.f32.mrf.mxu1 }
  0xe6   : > { %v4906_v37 = vpop.f32.mrf.mxu1 }
  0xe8   : > { %v4908_v38 = vpop.f32.mrf.mxu1 }
  0xed   : > { %v695_v3 = vpop.f32.mrf.mxu0 }
  0xee   : > { %v696_v5 = vadd.f32 %v695_v3, %v435_v1  ;;  %v4209_v3 = vld [vmem:[%s5819_s3 + $0x26c] ss:$16 sps:$4 sm:$0xff]  }
  0xef   : > { %v4817_v4 = vpop.f32.mrf.mxu0 }
  0xf0   : > { %v708_v8 = vmax.f32 %v696_v5, 0.0  ;;  %v4204_v5 = vld [vmem:[%s5819_s3 + $0xa8] ss:$16 sps:$4 sm:$0xff]  }
  0xf1   : > { %v699_v6 = vpop.f32.mrf.mxu0 }
  0xf2   : > { %v700_v7 = vadd.f32 %v699_v6, %v435_v1  ;;  %v4206_v1 = vld [vmem:[%s5819_s3 + $0xac] ss:$16 sps:$4 sm:$0xff]   ;;  %v4207_v6 = vld [vmem:[%s5819_s3 + $0x268] ss:$16 sps:$4 sm:$0xff]  }
  0xf4   : > { %v714_v10 = vmax.f32 %v700_v7, 0.0  ;;  %v4212_v7 = vld [vmem:[%s5819_s3 + $0x8c] ss:$16 sps:$4 sm:$0xff]  }
  0xf6   : > { %v4819_v11 = vpack.c.bf16 %v714_v10, %v708_v8  ;;  %v4215_v8 = vld [vmem:[%s5819_s3 + $0x24c] ss:$16 sps:$4 sm:$0xff]   ;;  %v438_v10 = vsub.s32 5, %v4804_v60 }
  0xf8   : > { %3993 = vmatpush3.bf16.msra.mxu1 %v4819_v11  ;;  %1455 = vmatprep.mubr.bf16.mxu0 %v4819_v11 }
  0xf9   : > { %3998 = vmatprep.subr.bf16.mxu1 %v4545_v26 }
  0xfb   : > { %3995 = vmatmul.mubr.msk.bf16.vlgmr.msra.gmra.mxu1 %vm726_vm2, %v4824_v12 }
  0xfc   : > { %3999 = vmatpush3.bf16.msra.mxu1 %v4819_v11  ;;  %4000 = vmatprep.mubr.msk.bf16.mxu1 %vm4546_vm1, %v4545_v26 }
  0xfd   : > { %1466 = vmatprep.subr.bf16.mxu1 %v4149_v13  ;;  %v4213_v13 = vld [vmem:[%s5819_s3 + $0x248] ss:$16 sps:$4 sm:$0xff]  }
 0x103   : > { %4001 = vmatmul.mubr.msk.bf16.vlgmr.msra.gmra.mxu1 %vm726_vm2, %v4840_v14 }
 0x104   : > { %1467 = vmatpush1.bf16.msra.mxu1 %v4147_v15  ;;  %1498 = vmatprep.mubr.bf16.mxu1 %v4544_v2  ;;  %v4218_v15 = vld [vmem:[%s5819_s3 + $0x6c] ss:$16 sps:$4 sm:$0xff]  }
 0x105   : > { %1468 = vmatprep.subr.bf16.mxu1 %v4155_v16  ;;  %v4221_v16 = vld [vmem:[%s5819_s3 + $0x22c] ss:$16 sps:$4 sm:$0xff]  }
 0x108   : > { %1469 = vmatpush1.bf16.msra.mxu1 %v4153_v17  ;;  %v701_v17 = vpop.f32.mrf.mxu0 }
 0x109   : > { %1470 = vmatprep.subr.bf16.mxu1 %v4161_v18  ;;  %v439_v18 = vrot.slane %v4812_v63, %v438_v10  ;;  %v4266_v10 = vld [vmem:[%s5821_s5 + $0x2a0] ss:$16 sps:$4 sm:$0xff]  }
 0x10b   : > { %v698_v24 = vadd.f32 %v4817_v4, %v439_v18  ;;  %v4228_v4 = vld [vmem:[%s5819_s3 + $0x28] ss:$16 sps:$4 sm:$0xff]  }
 0x10c   : > { %1471 = vmatpush1.bf16.msra.mxu1 %v4159_v19  ;;  %v4216_v19 = vld [vmem:[%s5819_s3 + $0x68] ss:$16 sps:$4 sm:$0xff]  }
 0x10d   : > { %1472 = vmatprep.subr.bf16.mxu1 %v4167_v20  ;;  %v4219_v20 = vld [vmem:[%s5819_s3 + $0x228] ss:$16 sps:$4 sm:$0xff]   ;;  %v709_v30 = vmax.f32 %v698_v24, 0.0  ;;  %v4314_v24 = vld [vmem:[%s5821_s5 + $0x40] ss:$16 sps:$4 sm:$0xff]  }
 0x110   : > { %1473 = vmatpush1.bf16.msra.mxu1 %v4165_v21  ;;  %v4224_v21 = vld [vmem:[%s5819_s3 + $0x4c] ss:$16 sps:$4 sm:$0xff]  }
 0x111   : > { %1474 = vmatprep.subr.bf16.mxu1 %v4173_v22  ;;  %v4227_v22 = vld [vmem:[%s5819_s3 + $0x20c] ss:$16 sps:$4 sm:$0xff]  }
 0x114   : > { %1475 = vmatpush1.bf16.msra.mxu1 %v4171_v23  ;;  %v702_v23 = vadd.f32 %v701_v17, %v439_v18  ;;  %v4304_v17 = vld [vmem:[%s5821_s5 + $0x84] ss:$16 sps:$4 sm:$0xff]   ;;  %v4272_v18 = vld [vmem:[%s5821_s5 + $0x260] ss:$16 sps:$4 sm:$0xff]  }
 0x115   : > { %1476 = vmatprep.subr.bf16.mxu1 %v4179_v25  ;;  %v4222_v25 = vld [vmem:[%s5819_s3 + $0x48] ss:$16 sps:$4 sm:$0xff]  }
 0x118   : > { %1477 = vmatpush1.bf16.msra.mxu1 %v4177_v28  ;;  %v4230_v28 = vld [vmem:[%s5819_s3 + $0x2c] ss:$16 sps:$4 sm:$0xff]  }
 0x119   : > { %1478 = vmatprep.subr.bf16.mxu1 %v4182_v29  ;;  %v715_v29 = vmax.f32 %v702_v23, 0.0  ;;  %v4280_v23 = vld [vmem:[%s5821_s5 + $0x224] ss:$16 sps:$4 sm:$0xff]  }
 0x11c   : > { %1479 = vmatpush1.bf16.msra.mxu1 %v4180_v31  ;;  %v4233_v31 = vld [vmem:[%s5819_s3 + $0xc] ss:$16 sps:$4 sm:$0xff]  }
 0x11d   : > { %1480 = vmatprep.subr.bf16.mxu1 %v4188_v32  ;;  %v5006_v32 = vpack.c.bf16 %v715_v29, %v709_v30  ;;  %v4320_v29 = vld [vmem:[%s5821_s5 + $0x20] ss:$16 sps:$4 sm:$0xff]   ;;  %v4322_v30 = vld [vmem:[%s5821_s5 + $0x24] ss:$16 sps:$4 sm:$0xff]  }
 0x120   : > { %1481 = vmatpush1.bf16.msra.mxu1 %v4186_v33  ;;  %v4231_v33 = vld [vmem:[%s5819_s3 + $0x8] ss:$16 sps:$4 sm:$0xff]  }
 0x121   : > { %1509 = vmatprep.subr.bf16.mxu1 %v4194_v34  ;;  %v4236_v34 = vld [vmem:[%s5819_s3 + $0x1ec] ss:$16 sps:$4 sm:$0xff]  }
 0x1bb   : > { %v764_v39 = vpop.f32.mrf.mxu1 }
 0x1bd   : > { %v3996_v40 = vpop.f32.mrf.mxu1 }
 0x1be   : > { %v4234_v40 = vld [vmem:[%s5819_s3 + $0x1e8] ss:$16 sps:$4 sm:$0xff]  }
 0x1bf   : > { %v767_v41 = vpop.f32.mrf.mxu1 }
 0x1c0   : > { %v4913_v43 = vpack.c.bf16 %v767_v41, %v764_v39  ;;  %v4237_v39 = vld [vmem:[%s5825_s9] sm:$0xff]   ;;  %v4240_v41 = vld [vmem:[%s5819_s3 + $0x1cc] ss:$16 sps:$4 sm:$0xff]  }
 0x1c1   : > { %v3997_v45 = vpop.f32.mrf.mxu1 }
 0x1c2   : > { %1456 = vmatmul.mubr.bf16.vlgmr.msra.gmra.mxu0 %v4913_v43  ;;  %v4241_v45 = vld [vmem:[%s5819_s3 + $0x1a8] ss:$16 sps:$4 sm:$0xff]  }
 0x1c3   : > { %1553 = vmatpush1.bf16.msra.mxu0 %v4183_v42  ;;  %v817_v46 = vpop.f32.mrf.mxu1  ;;  %1584 = vmatprep.mubr.bf16.mxu0 %v4544_v2  ;;  %v4238_v42 = vld [vmem:[%s5819_s3 + $0x1c8] ss:$16 sps:$4 sm:$0xff]  }
 0x1c4   : > { %1554 = vmatprep.subr.bf16.mxu0 %v4191_v44  ;;  %v4243_v44 = vld [vmem:[%s5819_s3 + $0x1ac] ss:$16 sps:$4 sm:$0xff]  }
 0x1c5   : > { %v4002_v49 = vpop.f32.mrf.mxu1 }
 0x1c6   : > { %v4247_v49 = vld [vmem:[%s5819_s3 + $0x168] ss:$16 sps:$4 sm:$0xff]  }
 0x1c7   : > { %1555 = vmatpush1.bf16.msra.mxu0 %v4189_v47  ;;  %v820_v50 = vpop.f32.mrf.mxu1  ;;  %v4244_v47 = vld [vmem:[%s5819_s3 + $0x188] ss:$16 sps:$4 sm:$0xff]  }
 0x1c8   : > { %v824_v53 = vpack.c.bf16 %v820_v50, %v817_v46  ;;  %1556 = vmatprep.subr.bf16.mxu0 %v4197_v48  ;;  %v4246_v46 = vld [vmem:[%s5819_s3 + $0x18c] ss:$16 sps:$4 sm:$0xff]   ;;  %v4250_v50 = vld [vmem:[%s5819_s3 + $0x148] ss:$16 sps:$4 sm:$0xff]  }
 0x1c9   : > { %v4003_v55 = vpop.f32.mrf.mxu1  ;;  %v4249_v48 = vld [vmem:[%s5819_s3 + $0x16c] ss:$16 sps:$4 sm:$0xff]  }
 0x1ca   : > { %1499 = vmatmul.mubr.bf16.vlgmr.msra.gmra.mxu1 %v824_v53  ;;  %v4262_v55 = vld [vmem:[%s5821_s5 + $0x2e4] ss:$16 sps:$4 sm:$0xff]  }
 0x1cb   : > { %1510 = vmatpush1.bf16.msra.mxu1 %v4192_v51  ;;  %1557 = vmatpush1.bf16.msra.mxu0 %v4195_v52  ;;  %v4255_v51 = vld [vmem:[%s5819_s3 + $0x12c] ss:$16 sps:$4 sm:$0xff]   ;;  %v4253_v52 = vld [vmem:[%s5819_s3 + $0x128] ss:$16 sps:$4 sm:$0xff]  }
 0x1cc   : > { %1541 = vmatprep.mubr.bf16.mxu1 %v4819_v11  ;;  %1511 = vmatprep.subr.bf16.mxu1 %v4200_v54  ;;  %v4210_v11 = vld [vmem:[%s5819_s3 + $0x88] ss:$16 sps:$4 sm:$0xff]  }
 0x1cd   : > { %1558 = vmatprep.subr.bf16.mxu0 %v4203_v56  ;;  %v4256_v54 = vld [vmem:[%s5819_s3 + $0x108] ss:$16 sps:$4 sm:$0xff]   ;;  %v4286_v56 = vld [vmem:[%s5821_s5 + $0xe4] ss:$16 sps:$4 sm:$0xff]  }
 0x1cf   : > { %1512 = vmatpush1.bf16.msra.mxu1 %v4198_v58  ;;  %1559 = vmatpush1.bf16.msra.mxu0 %v4201_v62  ;;  %v4259_v58 = vld [vmem:[%s5825_s9 + $0x18] sm:$0xff]   ;;  %v4292_v62 = vld [vmem:[%s5821_s5 + $0xc4] ss:$16 sps:$4 sm:$0xff]  }
 0x1d0   : > { %1513 = vmatprep.subr.bf16.mxu1 %v4206_v1  ;;  %1560 = vmatprep.subr.bf16.mxu0 %v4209_v3  ;;  %v4265_v1 = vld [vmem:[%s5821_s5 + $0x2c4] ss:$16 sps:$4 sm:$0xff]   ;;  %v4290_v3 = vld [vmem:[%s5821_s5 + $0xc0] ss:$16 sps:$4 sm:$0xff]  }
 0x1d3   : > { %1514 = vmatpush1.bf16.msra.mxu1 %v4204_v5  ;;  %1561 = vmatpush1.bf16.msra.mxu0 %v4207_v6  ;;  %v4298_v5 = vld [vmem:[%s5821_s5 + $0xa4] ss:$16 sps:$4 sm:$0xff]   ;;  %v4263_v6 = vld [vmem:[%s5821_s5 + $0x2c0] ss:$16 sps:$4 sm:$0xff]  }
 0x1d4   : > { %1515 = vmatprep.subr.bf16.mxu1 %v4212_v7  ;;  %1562 = vmatprep.subr.bf16.mxu0 %v4215_v8  ;;  %v4268_v7 = vld [vmem:[%s5821_s5 + $0x2a4] ss:$16 sps:$4 sm:$0xff]   ;;  %v4296_v8 = vld [vmem:[%s5821_s5 + $0xa0] ss:$16 sps:$4 sm:$0xff]  }
 0x1d7   : > { %1516 = vmatpush1.bf16.msra.mxu1 %v4210_v11  ;;  %1563 = vmatpush1.bf16.msra.mxu0 %v4213_v13  ;;  %v4271_v11 = vld [vmem:[%s5821_s5 + $0x284] ss:$16 sps:$4 sm:$0xff]   ;;  %v4269_v13 = vld [vmem:[%s5821_s5 + $0x280] ss:$16 sps:$4 sm:$0xff]  }
 0x1d8   : > { %1517 = vmatprep.subr.bf16.mxu1 %v4218_v15  ;;  %1564 = vmatprep.subr.bf16.mxu0 %v4221_v16  ;;  %v4274_v15 = vld [vmem:[%s5821_s5 + $0x264] ss:$16 sps:$4 sm:$0xff]   ;;  %v4302_v16 = vld [vmem:[%s5821_s5 + $0x80] ss:$16 sps:$4 sm:$0xff]  }
 0x1db   : > { %1518 = vmatpush1.bf16.msra.mxu1 %v4216_v19  ;;  %1565 = vmatpush1.bf16.msra.mxu0 %v4219_v20  ;;  %v4277_v19 = vld [vmem:[%s5821_s5 + $0x244] ss:$16 sps:$4 sm:$0xff]   ;;  %v4308_v20 = vld [vmem:[%s5821_s5 + $0x60] ss:$16 sps:$4 sm:$0xff]  }
 0x1dc   : > { %1519 = vmatprep.subr.bf16.mxu1 %v4224_v21  ;;  %1566 = vmatprep.subr.bf16.mxu0 %v4227_v22  ;;  %v4310_v21 = vld [vmem:[%s5821_s5 + $0x64] ss:$16 sps:$4 sm:$0xff]   ;;  %v4275_v22 = vld [vmem:[%s5821_s5 + $0x240] ss:$16 sps:$4 sm:$0xff]  }
 0x1df   : > { %1520 = vmatpush1.bf16.msra.mxu1 %v4222_v25  ;;  %1567 = vmatpush1.bf16.msra.mxu0 %v4225_v27  ;;  %v4316_v25 = vld [vmem:[%s5821_s5 + $0x44] ss:$16 sps:$4 sm:$0xff]   ;;  %v4278_v27 = vld [vmem:[%s5821_s5 + $0x220] ss:$16 sps:$4 sm:$0xff]  }
 0x1e0   : > { %1521 = vmatprep.subr.bf16.mxu1 %v4230_v28  ;;  %4004 = vmatprep.subr.bf16.mxu0 %v4545_v26  ;;  %v4283_v28 = vld [vmem:[%s5821_s5 + $0x204] ss:$16 sps:$4 sm:$0xff]  }
 0x1e2   : > { %1585 = vmatmul.mubr.bf16.vlgmr.msra.gmra.mxu0 %v824_v53  ;;  %v4258_v53 = vld [vmem:[%s5819_s3 + $0x10c] ss:$16 sps:$4 sm:$0xff]  }
 0x1e3   : > { %1522 = vmatpush1.bf16.msra.mxu1 %v4228_v4  ;;  %4005 = vmatpush3.bf16.msra.mxu0 %v5006_v32  ;;  %v4281_v4 = vld [vmem:[%s5821_s5 + $0x200] ss:$16 sps:$4 sm:$0xff]  }
 0x1e4   : > { %1523 = vmatprep.subr.bf16.mxu1 %v4233_v31  ;;  %4006 = vmatprep.mubr.msk.bf16.mxu0 %vm4546_vm1, %v4545_v26  ;;  %v4289_v31 = vld [vmem:[%s5821_s5 + $0x3e4] ss:$16 sps:$4 sm:$0xff]  }
 0x1e5   : > { %4016 = vmatprep.subr.bf16.mxu0 %v4545_v26 }
 0x1e7   : > { %1524 = vmatpush1.bf16.msra.mxu1 %v4231_v33  ;;  %v4326_v33 = vld [vmem:[%s5821_s5] ss:$16 sps:$4 sm:$0xff]  }
 0x1e8   : > { %1525 = vmatprep.subr.bf16.mxu1 %v4236_v34  ;;  %v4328_v34 = vld [vmem:[%s5821_s5 + $0x4] ss:$16 sps:$4 sm:$0xff]  }
 0x1ea   : > { %4007 = vmatmul.mubr.msk.bf16.vlgmr.msra.gmra.mxu0 %vm726_vm2, %v4237_v39  ;;  %v4287_v39 = vld [vmem:[%s5821_s5 + $0x3e0] ss:$16 sps:$4 sm:$0xff]  }
 0x1eb   : > { %4017 = vmatpush3.bf16.msra.mxu0 %v5006_v32  ;;  %1526 = vmatpush2.bf16.msra.mxu1 %v4234_v40  ;;  %v4332_v40 = vld [vmem:[%s5821_s5 + $0x1e0] ss:$16 sps:$4 sm:$0xff]  }
 0x1ec   : > { %1527 = vmatprep.subr.bf16.mxu1 %v4240_v41  ;;  %4018 = vmatprep.mubr.msk.bf16.mxu0 %vm4546_vm1, %v4545_v26  ;;  %v4334_v41 = vld [vmem:[%s5821_s5 + $0x1e4] ss:$16 sps:$4 sm:$0xff]  }
 0x1ed   : > { %2782 = vmatprep.subr.bf16.mxu0 %v4286_v56  ;;  %v4358_v56 = vld [vmem:[%s5821_s5 + $0x164] ss:$16 sps:$4 sm:$0xff]  }
 0x1ef   : > { %1528 = vmatpush2.bf16.msra.mxu1 %v4238_v42  ;;  %v4295_v42 = vld [vmem:[%s5821_s5 + $0x3c4] ss:$16 sps:$4 sm:$0xff]  }
 0x1f0   : > { %1529 = vmatprep.subr.bf16.mxu1 %v4243_v44  ;;  %v4293_v44 = vld [vmem:[%s5821_s5 + $0x3c0] ss:$16 sps:$4 sm:$0xff]  }
 0x1f2   : > { %4019 = vmatmul.mubr.msk.bf16.vlgmr.msra.gmra.mxu0 %vm726_vm2, %v4840_v14  ;;  %v4252_v14 = vld [vmem:[%s5819_s3 + $0x14c] ss:$16 sps:$4 sm:$0xff]  }
 0x1f3   : > { %1530 = vmatpush2.bf16.msra.mxu1 %v4241_v45  ;;  %v4338_v45 = vld [vmem:[%s5821_s5 + $0x1c0] ss:$16 sps:$4 sm:$0xff]  }
 0x1f4   : > { %1531 = vmatprep.subr.bf16.mxu1 %v4246_v46  ;;  %v4340_v46 = vld [vmem:[%s5821_s5 + $0x1c4] ss:$16 sps:$4 sm:$0xff]  }
 0x1f7   : > { %1532 = vmatpush2.bf16.msra.mxu1 %v4244_v47  ;;  %v4301_v47 = vld [vmem:[%s5821_s5 + $0x3a4] ss:$16 sps:$4 sm:$0xff]  }
 0x1f8   : > { %1533 = vmatprep.subr.bf16.mxu1 %v4249_v48  ;;  %v4299_v48 = vld [vmem:[%s5821_s5 + $0x3a0] ss:$16 sps:$4 sm:$0xff]  }
 0x1fb   : > { %1534 = vmatpush2.bf16.msra.mxu1 %v4247_v49  ;;  %v4344_v49 = vld [vmem:[%s5821_s5 + $0x1a0] ss:$16 sps:$4 sm:$0xff]  }
 0x1fc   : > { %1535 = vmatprep.subr.bf16.mxu1 %v4252_v14  ;;  %v4346_v14 = vld [vmem:[%s5821_s5 + $0x1a4] ss:$16 sps:$4 sm:$0xff]  }
 0x1ff   : > { %1536 = vmatpush2.bf16.msra.mxu1 %v4250_v50  ;;  %v4307_v50 = vld [vmem:[%s5821_s5 + $0x384] ss:$16 sps:$4 sm:$0xff]  }
 0x200   : > { %1537 = vmatprep.subr.bf16.mxu1 %v4255_v51  ;;  %v4305_v51 = vld [vmem:[%s5821_s5 + $0x380] ss:$16 sps:$4 sm:$0xff]  }
 0x203   : > { %1538 = vmatpush2.bf16.msra.mxu1 %v4253_v52  ;;  %v4350_v52 = vld [vmem:[%s5821_s5 + $0x180] ss:$16 sps:$4 sm:$0xff]  }
 0x204   : > { %1539 = vmatprep.subr.bf16.mxu1 %v4258_v53  ;;  %v4352_v53 = vld [vmem:[%s5821_s5 + $0x184] ss:$16 sps:$4 sm:$0xff]  }
 0x207   : > { %1540 = vmatpush2.bf16.msra.mxu1 %v4256_v54  ;;  %v4313_v54 = vld [vmem:[%s5821_s5 + $0x364] ss:$16 sps:$4 sm:$0xff]  }
 0x208   : > { %4010 = vmatprep.subr.bf16.mxu1 %v4545_v26 }
 0x20a   : > { %1542 = vmatmul.mubr.bf16.vlgmr.msra.gmra.mxu1 %v4913_v43  ;;  %v4284_v43 = vld [vmem:[%s5821_s5 + $0xe0] ss:$16 sps:$4 sm:$0xff]  }
 0x20b   : > { %4011 = vmatpush3.bf16.msra.mxu1 %v5006_v32  ;;  %4012 = vmatprep.mubr.msk.bf16.mxu1 %vm4546_vm1, %v4545_v26 }
 0x20c   : > { %4022 = vmatprep.subr.bf16.mxu1 %v4545_v26  ;;  %2783 = vmatpush1.bf16.msra.mxu0 %v4284_v43  ;;  %v4356_v43 = vld [vmem:[%s5821_s5 + $0x160] ss:$16 sps:$4 sm:$0xff]  }
 0x20d   : > { %2784 = vmatprep.subr.bf16.mxu0 %v4292_v62  ;;  %v4325_v62 = vld [vmem:[%s5821_s5 + $0x324] ss:$16 sps:$4 sm:$0xff]  }
 0x210   : > { %2785 = vmatpush1.bf16.msra.mxu0 %v4290_v3  ;;  %v4362_v3 = vld [vmem:[%s5821_s5 + $0x140] ss:$16 sps:$4 sm:$0xff]  }
 0x211   : > { %2786 = vmatprep.subr.bf16.mxu0 %v4298_v5  ;;  %v4323_v5 = vld [vmem:[%s5821_s5 + $0x320] ss:$16 sps:$4 sm:$0xff]  }
 0x212   : > { %4013 = vmatmul.mubr.msk.bf16.vlgmr.msra.gmra.mxu1 %vm726_vm2, %v4824_v12  ;;  %v4260_v12 = vld [vmem:[%s5821_s5 + $0x2e0] ss:$16 sps:$4 sm:$0xff]  }
 0x213   : > { %4023 = vmatpush3.bf16.msra.mxu1 %v5006_v32  ;;  %4024 = vmatprep.mubr.msk.bf16.mxu1 %vm4546_vm1, %v4545_v26 }
 0x214   : > { %2825 = vmatprep.subr.bf16.mxu1 %v4262_v55  ;;  %2787 = vmatpush1.bf16.msra.mxu0 %v4296_v8  ;;  %v4311_v55 = vld [vmem:[%s5821_s5 + $0x360] ss:$16 sps:$4 sm:$0xff]  }
 0x215   : > { %2788 = vmatprep.subr.bf16.mxu0 %v4304_v17  ;;  %v4368_v8 = vld [vmem:[%s5821_s5 + $0x120] ss:$16 sps:$4 sm:$0xff]   ;;  %v5286_v17 = vsub.s32 0, %v4804_v60 }
 0x218   : > { %2789 = vmatpush1.bf16.msra.mxu0 %v4302_v16  ;;  %v4382_v16 = vld [vmem:[%s5821_s5 + $0x4e4] ss:$16 sps:$4 sm:$0xff]  }
 0x219   : > { %2790 = vmatprep.subr.bf16.mxu0 %v4310_v21  ;;  %v419_v21 = vrot.slane %v4812_v63, %v5286_v17 }
 0x21a   : > { %4025 = vmatmul.mubr.msk.bf16.vlgmr.msra.gmra.mxu1 %vm726_vm2, %v4259_v58  ;;  %v4319_v58 = vld [vmem:[%s5821_s5 + $0x344] ss:$16 sps:$4 sm:$0xff]  }
 0x21b   : > { %2826 = vmatpush1.bf16.msra.mxu1 %v4260_v12  ;;  %v4317_v12 = vld [vmem:[%s5821_s5 + $0x340] ss:$16 sps:$4 sm:$0xff]  }
 0x21c   : > { %2827 = vmatprep.subr.bf16.mxu1 %v4265_v1  ;;  %2791 = vmatpush1.bf16.msra.mxu0 %v4308_v20  ;;  %v4364_v1 = vld [vmem:[%s5821_s5 + $0x144] ss:$16 sps:$4 sm:$0xff]  }
 0x21d   : > { %2792 = vmatprep.subr.bf16.mxu0 %v4316_v25 }
 0x21f   : > { %2828 = vmatpush1.bf16.msra.mxu1 %v4263_v6  ;;  %v4331_v6 = vld [vmem:[%s5821_s5 + $0x304] ss:$16 sps:$4 sm:$0xff]  }
 0x220   : > { %2829 = vmatprep.subr.bf16.mxu1 %v4268_v7  ;;  %2793 = vmatpush1.bf16.msra.mxu0 %v4314_v24  ;;  %v4370_v7 = vld [vmem:[%s5821_s5 + $0x124] ss:$16 sps:$4 sm:$0xff]  }
 0x221   : > { %2794 = vmatprep.subr.bf16.mxu0 %v4322_v30 }
 0x223   : > { %2830 = vmatpush1.bf16.msra.mxu1 %v4266_v10  ;;  %v4329_v10 = vld [vmem:[%s5821_s5 + $0x300] ss:$16 sps:$4 sm:$0xff]  }
 0x224   : > { %2831 = vmatprep.subr.bf16.mxu1 %v4271_v11  ;;  %2795 = vmatpush1.bf16.msra.mxu0 %v4320_v29  ;;  %v4337_v11 = vld [vmem:[%s5821_s5 + $0xec] ss:$16 sps:$4 sm:$0xff]  }
 0x225   : > { %2796 = vmatprep.subr.bf16.mxu0 %v4328_v34 }
 0x227   : > { %2832 = vmatpush1.bf16.msra.mxu1 %v4269_v13  ;;  %v4376_v13 = vld [vmem:[%s5821_s5 + $0x104] ss:$16 sps:$4 sm:$0xff]  }
 0x228   : > { %2833 = vmatprep.subr.bf16.mxu1 %v4274_v15  ;;  %2797 = vmatpush1.bf16.msra.mxu0 %v4326_v33  ;;  %v4374_v15 = vld [vmem:[%s5821_s5 + $0x100] ss:$16 sps:$4 sm:$0xff]  }
 0x229   : > { %2798 = vmatprep.subr.bf16.mxu0 %v4334_v41  ;;  %v614_v41 = vadd.f32 %v4806_v61, %v419_v21 }
 0x22b   : > { %2834 = vmatpush1.bf16.msra.mxu1 %v4272_v18  ;;  %v5289_v18 = vsub.s32 1, %v4804_v60 }
 0x22c   : > { %2835 = vmatprep.subr.bf16.mxu1 %v4277_v19  ;;  %2799 = vmatpush2.bf16.msra.mxu0 %v4332_v40  ;;  %v5294_v19 = vld [vmem:[%s5820_s4] sm:$0xf] }
 0x22d   : > { %2800 = vmatprep.subr.bf16.mxu0 %v4340_v46  ;;  %v423_v24 = vrot.slane %v4812_v63, %v5289_v18  ;;  %v930_v25 = vrot.slane %v5294_v19, %v5289_v18 }
 0x22f   : > { %2836 = vmatpush1.bf16.msra.mxu1 %v4275_v22  ;;  %v612_v30 = vadd.f32 %v4802_v59, %v423_v24 }
 0x230   : > { %2837 = vmatprep.subr.bf16.mxu1 %v4280_v23  ;;  %2801 = vmatpush2.bf16.msra.mxu0 %v4338_v45  ;;  %v926_v23 = vrot.slane %v5294_v19, %v5286_v17 }
 0x231   : > { %2802 = vmatprep.subr.bf16.mxu0 %v4346_v14  ;;  %v705_v46 = vmax.f32 %v612_v30, 0.0  ;;  %v4359_v30 = vld [vmem:[%s5821_s5 + $0x68] ss:$16 sps:$4 sm:$0xff]  }
 0x233   : > { %2838 = vmatpush1.bf16.msra.mxu1 %v4278_v27  ;;  %v610_v27 = vadd.f32 %v4800_v57, %v419_v21  ;;  %v4349_v21 = vld [vmem:[%s5821_s5 + $0xac] ss:$16 sps:$4 sm:$0xff]  }
 0x234   : > { %2839 = vmatprep.subr.bf16.mxu1 %v4283_v28  ;;  %2803 = vmatpush2.bf16.msra.mxu0 %v4344_v49 }
 0x235   : > { %2804 = vmatprep.subr.bf16.mxu0 %v4352_v53  ;;  %v704_v34 = vmax.f32 %v610_v27, 0.0  ;;  %v5351_v27 = vsub.s32 3, %v4804_v60 }
 0x237   : > { %2840 = vmatpush1.bf16.msra.mxu1 %v4281_v4 }
 0x238   : > { %2841 = vmatprep.subr.bf16.mxu1 %v4289_v31  ;;  %2805 = vmatpush2.bf16.msra.mxu0 %v4350_v52 }
 0x239   : > { %2806 = vmatprep.subr.bf16.mxu0 %v4358_v56 }
 0x23b   : > { %2842 = vmatpush2.bf16.msra.mxu1 %v4287_v39 }
 0x23c   : > { %2843 = vmatprep.subr.bf16.mxu1 %v4295_v42  ;;  %2807 = vmatpush2.bf16.msra.mxu0 %v4356_v43 }
 0x23d   : > { %2808 = vmatprep.subr.bf16.mxu0 %v4364_v1 }
 0x23f   : > { %2844 = vmatpush2.bf16.msra.mxu1 %v4293_v44 }
 0x240   : > { %2845 = vmatprep.subr.bf16.mxu1 %v4301_v47  ;;  %2809 = vmatpush2.bf16.msra.mxu0 %v4362_v3  ;;  %v616_v47 = vadd.f32 %v4814_v0, %v423_v24  ;;  %v5345_v24 = vsub.s32 2, %v4804_v60  ;;  %v5365_v60 = vrot.slane %v4812_v63, %v5351_v27 }
 0x241   : > { %2810 = vmatprep.subr.bf16.mxu0 %v4370_v7 }
 0x243   : > { %2846 = vmatpush2.bf16.msra.mxu1 %v4299_v48 }
 0x244   : > { %2847 = vmatprep.subr.bf16.mxu1 %v4307_v50  ;;  %2811 = vmatpush2.bf16.msra.mxu0 %v4368_v8 }
 0x245   : > { %2812 = vmatprep.subr.bf16.mxu0 %v4376_v13  ;;  %v4335_v13 = vld [vmem:[%s5821_s5 + $0xe8] ss:$16 sps:$4 sm:$0xff]  }
 0x247   : > { %2848 = vmatpush2.bf16.msra.mxu1 %v4305_v51  ;;  %v710_v51 = vmax.f32 %v614_v41, 0.0  ;;  %v4365_v41 = vld [vmem:[%s5821_s5 + $0x48] ss:$16 sps:$4 sm:$0xff]  }
 0x248   : > { %2849 = vmatprep.subr.bf16.mxu1 %v4313_v54  ;;  %2813 = vmatpush2.bf16.msra.mxu0 %v4374_v15  ;;  %v4343_v15 = vld [vmem:[%s5821_s5 + $0xcc] ss:$16 sps:$4 sm:$0xff]  }
 0x249   : > { %2868 = vmatprep.subr.bf16.mxu0 %v4382_v16 }
 0x24b   : > { %2850 = vmatpush2.bf16.msra.mxu1 %v4311_v55  ;;  %v711_v55 = vmax.f32 %v616_v47, 0.0 }
 0x24c   : > { %2851 = vmatprep.subr.bf16.mxu1 %v4319_v58 }
 0x24f   : > { %2852 = vmatpush2.bf16.msra.mxu1 %v4317_v12 }
 0x250   : > { %2853 = vmatprep.subr.bf16.mxu1 %v4325_v62 }
 0x253   : > { %2854 = vmatpush2.bf16.msra.mxu1 %v4323_v5 }
 0x254   : > { %2855 = vmatprep.subr.bf16.mxu1 %v4331_v6 }
 0x257   : > { %2856 = vmatpush2.bf16.msra.mxu1 %v4329_v10 }
 0x258   : > { %2911 = vmatprep.subr.bf16.mxu1 %v4337_v11 }
 0x282   : > { %v1457_v20 = vpop.f32.mrf.mxu0 }
 0x283   : > { %v1458_v29 = vadd.f32 %v1457_v20, %v926_v23  ;;  %v4341_v20 = vld [vmem:[%s5821_s5 + $0xc8] ss:$16 sps:$4 sm:$0xff]  }
 0x284   : > { %v1459_v22 = vpop.f32.mrf.mxu0 }
 0x285   : > { %v1460_v31 = vadd.f32 %v1459_v22, %v930_v25  ;;  %v4347_v22 = vld [vmem:[%s5821_s5 + $0xa8] ss:$16 sps:$4 sm:$0xff]  }
 0x286   : > { %v1461_v28 = vpop.f32.mrf.mxu0 }
 0x287   : > { %v1462_v42 = vadd.f32 %v1461_v28, %v926_v23  ;;  %v4355_v23 = vld [vmem:[%s5821_s5 + $0x8c] ss:$16 sps:$4 sm:$0xff]  }
 0x288   : > { %v1463_v39 = vpop.f32.mrf.mxu0  ;;  %v4361_v28 = vld [vmem:[%s5821_s5 + $0x6c] ss:$16 sps:$4 sm:$0xff]  }
 0x289   : > { %v1464_v57 = vadd.f32 %v1463_v39, %v930_v25  ;;  %v4353_v25 = vld [vmem:[%s5821_s5 + $0x88] ss:$16 sps:$4 sm:$0xff]  }
 0x28a   : > { %v1500_v4 = vpop.f32.mrf.mxu1 }
 0x28b   : > { %v1501_v33 = vadd.f32 %v1500_v4, %v1458_v29  ;;  %v427_v29 = vrot.slane %v4812_v63, %v5345_v24  ;;  %v934_v4 = vrot.slane %v5294_v19, %v5345_v24  ;;  %v655_v63 = vadd.f32 %v4904_v36, %v5365_v60  ;;  %v4371_v36 = vld [vmem:[%s5821_s5 + $0x28] ss:$16 sps:$4 sm:$0xff]  }
 0x28c   : > { %v1502_v40 = vpop.f32.mrf.mxu1 }
 0x28d   : > { %v1595_v44 = vmax.f32 %v1501_v33, 0.0  ;;  %v1503_v45 = vadd.f32 %v1502_v40, %v1460_v31  ;;  %v4367_v31 = vld [vmem:[%s5821_s5 + $0x4c] ss:$16 sps:$4 sm:$0xff]   ;;  %v938_v33 = vrot.slane %v5294_v19, %v5351_v27  ;;  %v657_v47 = vadd.f32 %v4906_v37, %v427_v29 }
 0x28e   : > { %v1504_v48 = vpop.f32.mrf.mxu1 }
 0x28f   : > { %v5308_v49 = vadd.f32 %v1595_v44, %v704_v34  ;;  %v1596_v14 = vmax.f32 %v1503_v45, 0.0  ;;  %v1505_v59 = vadd.f32 %v1504_v48, %v1462_v42  ;;  %v653_v34 = vadd.f32 %v4902_v35, %v427_v29  ;;  %v4373_v44 = vld [vmem:[%s5821_s5 + $0x2c] ss:$16 sps:$4 sm:$0xff]  }
 0x290   : > { %v1506_v50 = vpop.f32.mrf.mxu1  ;;  %v4397_v29 = vld [vmem:[%s5821_s5 + $0x1ac] ss:$16 sps:$4 sm:$0xff]  }
 0x291   : > { %v5310_v52 = vadd.f32 %v1596_v14, %v705_v46  ;;  %v1599_v53 = vmax.f32 %v1505_v59, 0.0  ;;  %v1507_v54 = vadd.f32 %v1506_v50, %v1464_v57  ;;  %v706_v46 = vmax.f32 %v653_v34, 0.0  ;;  %v4400_v34 = vld [vmem:[%s5821_s5 + $0x484] ss:$16 sps:$4 sm:$0xff]  }
 0x292   : > { %v707_v59 = vmax.f32 %v655_v63, 0.0  ;;  %v4401_v63 = vld [vmem:[%s5821_s5 + $0x188] ss:$16 sps:$4 sm:$0xff]  }
 0x293   : > { %v5312_v61 = vadd.f32 %v1599_v53, %v710_v51  ;;  %v1600_v43 = vmax.f32 %v1507_v54, 0.0  ;;  %v4379_v51 = vld [vmem:[%s5821_s5 + $0xc] ss:$16 sps:$4 sm:$0xff]  }
 0x295   : > { %v5314_v56 = vadd.f32 %v1600_v43, %v711_v55 }
 0x2a2   : > { %v1586_v58 = vpop.f32.mrf.mxu0 }
 0x2a4   : > { %v1588_v0 = vpop.f32.mrf.mxu0 }
 0x2a6   : > { %v1590_v12 = vpop.f32.mrf.mxu0 }
 0x2a8   : > { %v5316_v62 = vpop.f32.mrf.mxu0 }
 0x2aa   : > { %v5318_v1 = vpop.f32.mrf.mxu0 }
 0x2ac   : > { %v4008_v3 = vpop.f32.mrf.mxu0 }
 0x2ae   : > { %v5320_v5 = vpop.f32.mrf.mxu0 }
 0x2b0   : > { %v4009_v6 = vpop.f32.mrf.mxu0 }
 0x2b2   : > { %v1739_v7 = vpop.f32.mrf.mxu0 }
 0x2b4   : > { %v4020_v8 = vpop.f32.mrf.mxu0 }
 0x2b6   : > { %v1742_v10 = vpop.f32.mrf.mxu0 }
 0x2b7   : > { %v5322_v11 = vpack.c.bf16 %v1742_v10, %v1739_v7  ;;  %v4377_v7 = vld [vmem:[%s5821_s5 + $0x8] ss:$16 sps:$4 sm:$0xff]  }
 0x2b8   : > { %v4021_v16 = vpop.f32.mrf.mxu0 }
 0x2b9   : > { %2857 = vmatprep.mubr.bf16.mxu1 %v5322_v11  ;;  %v4383_v16 = vld [vmem:[%s5821_s5 + $0x1e8] ss:$16 sps:$4 sm:$0xff]  }
 0x2ba   : > { %2858 = vmatmul.mubr.bf16.vlgmr.msra.gmra.mxu1 %v5006_v32 }
 0x2bb   : > { %2912 = vmatpush1.bf16.msra.mxu1 %v4335_v13 }
 0x2bc   : > { %2913 = vmatprep.subr.bf16.mxu1 %v4343_v15 }
 0x2bf   : > { %2914 = vmatpush1.bf16.msra.mxu1 %v4341_v20  ;;  %v5411_v20 = vpack.c.bf16 %v5320_v5, %v5318_v1  ;;  %v4386_v1 = vld [vmem:[%s5821_s5 + $0x4c0] ss:$16 sps:$4 sm:$0xff]   ;;  %v4389_v5 = vld [vmem:[%s5821_s5 + $0x1c8] ss:$16 sps:$4 sm:$0xff]  }
 0x2c0   : > { %2915 = vmatprep.subr.bf16.mxu1 %v4349_v21 }
 0x2c3   : > { %2916 = vmatpush1.bf16.msra.mxu1 %v4347_v22  ;;  %v4388_v22 = vld [vmem:[%s5821_s5 + $0x4c4] ss:$16 sps:$4 sm:$0xff]  }
 0x2c4   : > { %2917 = vmatprep.subr.bf16.mxu1 %v4355_v23  ;;  %v4391_v23 = vld [vmem:[%s5821_s5 + $0x1cc] ss:$16 sps:$4 sm:$0xff]  }
 0x2c7   : > { %2918 = vmatpush1.bf16.msra.mxu1 %v4353_v25 }
 0x2c8   : > { %2919 = vmatprep.subr.bf16.mxu1 %v4361_v28  ;;  %v4394_v28 = vld [vmem:[%s5821_s5 + $0x4a4] ss:$16 sps:$4 sm:$0xff]  }
 0x2ca   : > { %v1543_v39 = vpop.f32.mrf.mxu1 }
 0x2cb   : > { %v1544_v40 = vadd.f32 %v1543_v39, %v934_v4  ;;  %2920 = vmatpush1.bf16.msra.mxu1 %v4359_v30  ;;  %v4403_v39 = vld [vmem:[%s5821_s5 + $0x18c] ss:$16 sps:$4 sm:$0xff]  }
 0x2cc   : > { %v1545_v42 = vpop.f32.mrf.mxu1  ;;  %2921 = vmatprep.subr.bf16.mxu1 %v4367_v31  ;;  %v4392_v31 = vld [vmem:[%s5821_s5 + $0x4a0] ss:$16 sps:$4 sm:$0xff]  }
 0x2cd   : > { %v1587_v45 = vadd.f32 %v1586_v58, %v1544_v40  ;;  %v1546_v19 = vadd.f32 %v1545_v42, %v938_v33  ;;  %v712_v58 = vmax.f32 %v657_v47, 0.0  ;;  %v4406_v42 = vld [vmem:[%s5821_s5 + $0x464] ss:$16 sps:$4 sm:$0xff]   ;;  %v4410_v47 = vld [vmem:[%s5821_s5 + $0x440] ss:$16 sps:$4 sm:$0xff]  }
 0x2ce   : > { %v1547_v35 = vpop.f32.mrf.mxu1 }
 0x2cf   : > { %v1597_v48 = vmax.f32 %v1587_v45, 0.0  ;;  %v1589_v57 = vadd.f32 %v1588_v0, %v1546_v19  ;;  %v1548_v14 = vadd.f32 %v1547_v35, %v934_v4  ;;  %2922 = vmatpush1.bf16.msra.mxu1 %v4365_v41  ;;  %v4398_v41 = vld [vmem:[%s5821_s5 + $0x480] ss:$16 sps:$4 sm:$0xff]   ;;  %v4407_v19 = vld [vmem:[%s5821_s5 + $0x168] ss:$16 sps:$4 sm:$0xff]  }
 0x2d0   : > { %v1549_v50 = vpop.f32.mrf.mxu1  ;;  %2923 = vmatprep.subr.bf16.mxu1 %v4373_v44  ;;  %v4409_v44 = vld [vmem:[%s5821_s5 + $0x16c] ss:$16 sps:$4 sm:$0xff]   ;;  %v4404_v45 = vld [vmem:[%s5821_s5 + $0x460] ss:$16 sps:$4 sm:$0xff]  }
 0x2d1   : > { %v5388_v53 = vadd.f32 %v1597_v48, %v706_v46  ;;  %v1598_v54 = vmax.f32 %v1589_v57, 0.0  ;;  %v1591_v55 = vadd.f32 %v1590_v12, %v1548_v14  ;;  %v1550_v37 = vadd.f32 %v1549_v50, %v938_v33  ;;  %v4385_v12 = vld [vmem:[%s5821_s5 + $0x1ec] ss:$16 sps:$4 sm:$0xff]   ;;  %v4395_v33 = vld [vmem:[%s5821_s5 + $0x1a8] ss:$16 sps:$4 sm:$0xff]  }
 0x2d2   : > { %v1697_v43 = vpop.f32.mrf.mxu1  ;;  %v4412_v46 = vld [vmem:[%s5821_s5 + $0x444] ss:$16 sps:$4 sm:$0xff]   ;;  %v4415_v35 = vld [vmem:[%s5821_s5 + $0x14c] ss:$16 sps:$4 sm:$0xff]   ;;  %v4413_v48 = vld [vmem:[%s5821_s5 + $0x148] ss:$16 sps:$4 sm:$0xff]  }
 0x2d3   : > { %v5390_v0 = vadd.f32 %v1598_v54, %v707_v59  ;;  %v1601_v3 = vmax.f32 %v1591_v55, 0.0  ;;  %v5393_v6 = vadd.f32 %v5316_v62, %v1550_v37  ;;  %2924 = vmatpush1.bf16.msra.mxu1 %v4371_v36  ;;  %v4380_v62 = vld [vmem:[%s5821_s5 + $0x4e0] ss:$16 sps:$4 sm:$0xff]   ;;  %v4418_v57 = vld [vmem:[%s5821_s5 + $0x424] ss:$16 sps:$4 sm:$0xff]  }
 0x2d4   : > { %v4014_v8 = vpop.f32.mrf.mxu1  ;;  %2925 = vmatprep.subr.bf16.mxu1 %v4379_v51  ;;  %v4421_v14 = vld [vmem:[%s5821_s5 + $0x12c] ss:$16 sps:$4 sm:$0xff]   ;;  %v4416_v36 = vld [vmem:[%s5821_s5 + $0x420] ss:$16 sps:$4 sm:$0xff]   ;;  %v4419_v59 = vld [vmem:[%s5821_s5 + $0x128] ss:$16 sps:$4 sm:$0xff]  }
 0x2d5   : > { %v5401_v10 = vadd.f32 %v1601_v3, %v712_v58  ;;  %v4424_v50 = vld [vmem:[%s5821_s5 + $0x404] ss:$16 sps:$4 sm:$0xff]   ;;  %v4427_v51 = vld [vmem:[%s5821_s5 + $0x10c] ss:$16 sps:$4 sm:$0xff]   ;;  %v4422_v54 = vld [vmem:[%s5821_s5 + $0x400] ss:$16 sps:$4 sm:$0xff]  }
 0x2d6   : > { %v1700_v13 = vpop.f32.mrf.mxu1  ;;  %v4425_v55 = vld [vmem:[%s5821_s5 + $0x108] ss:$16 sps:$4 sm:$0xff]   ;;  %v4430_v37 = vld [vmem:[%s5821_s5 + $0x2ec] ss:$16 sps:$4 sm:$0xff]  }
 0x2d7   : > { %v1704_v15 = vpack.c.bf16 %v1700_v13, %v1697_v43  ;;  %2926 = vmatpush1.bf16.msra.mxu1 %v4377_v7  ;;  %v4433_v43 = vld [vmem:[%s5821_s5 + $0x4ec] ss:$16 sps:$4 sm:$0xff]   ;;  %v4428_v58 = vld [vmem:[%s5821_s5 + $0x2e8] ss:$16 sps:$4 sm:$0xff]  }
 0x2d8   : > { %v4015_v21 = vpop.f32.mrf.mxu1  ;;  %2927 = vmatprep.subr.bf16.mxu1 %v4385_v12  ;;  %v4431_v7 = vld [vmem:[%s5821_s5 + $0x4e8] ss:$16 sps:$4 sm:$0xff]   ;;  %v4436_v8 = vld [vmem:[%s5821_s5 + $0x2cc] ss:$16 sps:$4 sm:$0xff]  }
 0x2d9   : > { %2814 = vmatprep.mubr.bf16.mxu0 %v1704_v15  ;;  %2943 = vmatprep.mubr.bf16.mxu1 %v1704_v15  ;;  %v4439_v12 = vld [vmem:[%s5821_s5 + $0x4cc] ss:$16 sps:$4 sm:$0xff]   ;;  %v4434_v13 = vld [vmem:[%s5821_s5 + $0x2c8] ss:$16 sps:$4 sm:$0xff]  }
 0x2da   : > { %2815 = vmatmul.mubr.bf16.vlgmr.msra.gmra.mxu0 %v5411_v20  ;;  %v5420_v25 = vpop.f32.mrf.mxu1  ;;  %v4437_v15 = vld [vmem:[%s5821_s5 + $0x4c8] ss:$16 sps:$4 sm:$0xff]   ;;  %v4448_v21 = vld [vmem:[%s5821_s5 + $0x28c] ss:$16 sps:$4 sm:$0xff]  }
 0x2db   : > { %2869 = vmatpush1.bf16.msra.mxu0 %v4380_v62  ;;  %2928 = vmatpush2.bf16.msra.mxu1 %v4383_v16  ;;  %v4442_v62 = vld [vmem:[%s5821_s5 + $0x2ac] ss:$16 sps:$4 sm:$0xff]  }
 0x2dc   : > { %2870 = vmatprep.subr.bf16.mxu0 %v4388_v22  ;;  %2929 = vmatprep.subr.bf16.mxu1 %v4391_v23  ;;  %v4026_v30 = vpop.f32.mrf.mxu1  ;;  %v4445_v16 = vld [vmem:[%s5821_s5 + $0x4ac] ss:$16 sps:$4 sm:$0xff]   ;;  %v4446_v23 = vld [vmem:[%s5821_s5 + $0x288] ss:$16 sps:$4 sm:$0xff]  }
 0x2dd   : > { %2900 = vmatprep.mubr.bf16.mxu0 %v4544_v2  ;;  %v4451_v22 = vld [vmem:[%s5821_s5 + $0x48c] ss:$16 sps:$4 sm:$0xff]  }
 0x2de   : > { %v1795_v4 = vpop.f32.mrf.mxu1  ;;  %v4460_v30 = vld [vmem:[%s5821_s5 + $0x24c] ss:$16 sps:$4 sm:$0xff]  }
 0x2df   : > { %2871 = vmatpush1.bf16.msra.mxu0 %v4386_v1  ;;  %2930 = vmatpush2.bf16.msra.mxu1 %v4389_v5  ;;  %v5511_v3 = vpack.c.bf16 %v1795_v4, %v5420_v25  ;;  %v4449_v25 = vld [vmem:[%s5821_s5 + $0x488] ss:$16 sps:$4 sm:$0xff]   ;;  %v4454_v1 = vld [vmem:[%s5821_s5 + $0x26c] ss:$16 sps:$4 sm:$0xff]  }
 0x2e0   : > { %2872 = vmatprep.subr.bf16.mxu0 %v4394_v28  ;;  %2931 = vmatprep.subr.bf16.mxu1 %v4397_v29  ;;  %v4027_v40 = vpop.f32.mrf.mxu1  ;;  %v4457_v5 = vld [vmem:[%s5821_s5 + $0x46c] ss:$16 sps:$4 sm:$0xff]   ;;  %v4452_v28 = vld [vmem:[%s5821_s5 + $0x268] ss:$16 sps:$4 sm:$0xff]  }
 0x2e1   : > { %v4455_v29 = vld [vmem:[%s5821_s5 + $0x468] ss:$16 sps:$4 sm:$0xff]   ;;  %v4463_v4 = vld [vmem:[%s5821_s5 + $0x44c] ss:$16 sps:$4 sm:$0xff]  }
 0x2e2   : > { %v4464_v40 = vld [vmem:[%s5821_s5 + $0x228] ss:$16 sps:$4 sm:$0xff]  }
 0x2e3   : > { %2873 = vmatpush1.bf16.msra.mxu0 %v4392_v31  ;;  %2932 = vmatpush2.bf16.msra.mxu1 %v4395_v33  ;;  %v4458_v31 = vld [vmem:[%s5821_s5 + $0x248] ss:$16 sps:$4 sm:$0xff]  }
 0x2e4   : > { %2874 = vmatprep.subr.bf16.mxu0 %v4400_v34  ;;  %2933 = vmatprep.subr.bf16.mxu1 %v4403_v39  ;;  %v4461_v33 = vld [vmem:[%s5821_s5 + $0x448] ss:$16 sps:$4 sm:$0xff]   ;;  %v4466_v34 = vld [vmem:[%s5821_s5 + $0x22c] ss:$16 sps:$4 sm:$0xff]  }
 0x2e5   : > { %v4469_v39 = vld [vmem:[%s5821_s5 + $0x42c] ss:$16 sps:$4 sm:$0xff]  }
 0x2e7   : > { %2875 = vmatpush1.bf16.msra.mxu0 %v4398_v41  ;;  %2934 = vmatpush2.bf16.msra.mxu1 %v4401_v63  ;;  %v4467_v41 = vld [vmem:[%s5821_s5 + $0x428] ss:$16 sps:$4 sm:$0xff]   ;;  %v4472_v63 = vld [vmem:[%s5821_s5 + $0x20c] ss:$16 sps:$4 sm:$0xff]  }
 0x2e8   : > { %2876 = vmatprep.subr.bf16.mxu0 %v4406_v42  ;;  %2935 = vmatprep.subr.bf16.mxu1 %v4409_v44  ;;  %v4475_v42 = vld [vmem:[%s5821_s5 + $0x40c] ss:$16 sps:$4 sm:$0xff]   ;;  %v4470_v44 = vld [vmem:[%s5821_s5 + $0x208] ss:$16 sps:$4 sm:$0xff]  }
 0x2eb   : > { %2877 = vmatpush1.bf16.msra.mxu0 %v4404_v45  ;;  %2936 = vmatpush2.bf16.msra.mxu1 %v4407_v19  ;;  %v4473_v45 = vld [vmem:[%s5821_s5 + $0x408] ss:$16 sps:$4 sm:$0xff]   ;;  %v4478_v19 = vld [vmem:[%s5821_s5 + $0x3ec] ss:$16 sps:$4 sm:$0xff]  }
 0x2ec   : > { %2878 = vmatprep.subr.bf16.mxu0 %v4412_v46  ;;  %2937 = vmatprep.subr.bf16.mxu1 %v4415_v35  ;;  %v4476_v46 = vld [vmem:[%s5821_s5 + $0x3e8] ss:$16 sps:$4 sm:$0xff]   ;;  %v4481_v35 = vld [vmem:[%s5821_s5 + $0x3cc] ss:$16 sps:$4 sm:$0xff]  }
 0x2ef   : > { %2879 = vmatpush1.bf16.msra.mxu0 %v4410_v47  ;;  %2938 = vmatpush2.bf16.msra.mxu1 %v4413_v48  ;;  %v4479_v47 = vld [vmem:[%s5821_s5 + $0x3c8] ss:$16 sps:$4 sm:$0xff]   ;;  %v4484_v48 = vld [vmem:[%s5821_s5 + $0x3ac] ss:$16 sps:$4 sm:$0xff]  }
 0x2f0   : > { %2880 = vmatprep.subr.bf16.mxu0 %v4418_v57  ;;  %2939 = vmatprep.subr.bf16.mxu1 %v4421_v14  ;;  %v4482_v57 = vld [vmem:[%s5821_s5 + $0x3a8] ss:$16 sps:$4 sm:$0xff]  }
 0x2f1   : > { %v4500_v14 = vld [vmem:[%s5825_s9 + $0x28] sm:$0xff]  }
 0x2f3   : > { %2881 = vmatpush1.bf16.msra.mxu0 %v4416_v36  ;;  %2940 = vmatpush2.bf16.msra.mxu1 %v4419_v59  ;;  %v4487_v36 = vld [vmem:[%s5821_s5 + $0x38c] ss:$16 sps:$4 sm:$0xff]   ;;  %v4485_v59 = vld [vmem:[%s5821_s5 + $0x388] ss:$16 sps:$4 sm:$0xff]  }
 0x2f4   : > { %2882 = vmatprep.subr.bf16.mxu0 %v4424_v50  ;;  %2941 = vmatprep.subr.bf16.mxu1 %v4427_v51  ;;  %v4490_v50 = vld [vmem:[%s5821_s5 + $0x36c] ss:$16 sps:$4 sm:$0xff]   ;;  %v4488_v51 = vld [vmem:[%s5821_s5 + $0x368] ss:$16 sps:$4 sm:$0xff]  }
 0x2f7   : > { %2883 = vmatpush1.bf16.msra.mxu0 %v4422_v54  ;;  %2942 = vmatpush2.bf16.msra.mxu1 %v4425_v55  ;;  %v4493_v54 = vld [vmem:[%s5821_s5 + $0x34c] ss:$16 sps:$4 sm:$0xff]   ;;  %v4491_v55 = vld [vmem:[%s5821_s5 + $0x348] ss:$16 sps:$4 sm:$0xff]  }
 0x2f8   : > { %2954 = vmatprep.subr.bf16.mxu0 %v4430_v37  ;;  %2997 = vmatprep.subr.bf16.mxu1 %v4433_v43  ;;  %v4496_v37 = vld [vmem:[%s5821_s5 + $0x32c] ss:$16 sps:$4 sm:$0xff]   ;;  %v4494_v43 = vld [vmem:[%s5821_s5 + $0x328] ss:$16 sps:$4 sm:$0xff]  }
 0x2fa   : > { %2901 = vmatmul.mubr.bf16.vlgmr.msra.gmra.mxu0 %v5511_v3  ;;  %2944 = vmatmul.mubr.bf16.vlgmr.msra.gmra.mxu1 %v5411_v20  ;;  %v4443_v20 = vld [vmem:[%s5821_s5 + $0x4a8] ss:$16 sps:$4 sm:$0xff]  }
 0x2fb   : > { %2955 = vmatpush1.bf16.msra.mxu0 %v4428_v58  ;;  %2986 = vmatprep.mubr.bf16.mxu0 %v5322_v11  ;;  %v4440_v11 = vld [vmem:[%s5821_s5 + $0x2a8] ss:$16 sps:$4 sm:$0xff]   ;;  %v4499_v58 = vld [vmem:[%s5821_s5 + $0x30c] ss:$16 sps:$4 sm:$0xff]  }
 0x2fc   : > { %2998 = vmatpush1.bf16.msra.mxu1 %v4431_v7  ;;  %2956 = vmatprep.subr.bf16.mxu0 %v4436_v8  ;;  %v4501_v7 = vld [vmem:[%s5825_s9 + $0x20] sm:$0xff]   ;;  %v4504_v8 = vld [vmem:[%s5826_s10 + $0x10] sm:$0xff]  }
 0x2fd   : > { %2999 = vmatprep.subr.bf16.mxu1 %v4439_v12  ;;  %3029 = vmatprep.mubr.bf16.mxu1 %v4544_v2  ;;  %v4505_v12 = vld [vmem:[%s5826_s10 + $0x30] sm:$0xff]  }
 0x2ff   : > { %2957 = vmatpush1.bf16.msra.mxu0 %v4434_v13  ;;  %v4506_v13 = vld [vmem:[%s5826_s10 + $0x8] sm:$0xff]  }
 0x300   : > { %3000 = vmatpush1.bf16.msra.mxu1 %v4437_v15  ;;  %2958 = vmatprep.subr.bf16.mxu0 %v4442_v62  ;;  %v4507_v15 = vld [vmem:[%s5826_s10 + $0x28] sm:$0xff]   ;;  %v4508_v62 = vld [vmem:[%s5826_s10] sm:$0xff]  }
 0x301   : > { %3001 = vmatprep.subr.bf16.mxu1 %v4445_v16  ;;  %v4509_v16 = vld [vmem:[%s5826_s10 + $0x20] sm:$0xff]  }
 0x303   : > { %2959 = vmatpush1.bf16.msra.mxu0 %v4440_v11  ;;  %v4512_v11 = vld [vmem:[%s5823_s7 + $0x64] ss:$16 sps:$4 sm:$0xff]  }
 0x304   : > { %3002 = vmatpush1.bf16.msra.mxu1 %v4443_v20  ;;  %2960 = vmatprep.subr.bf16.mxu0 %v4448_v21  ;;  %v4515_v20 = vld [vmem:[%s5823_s7 + $0x6c] ss:$16 sps:$4 sm:$0xff]  }
 0x305   : > { %3003 = vmatprep.subr.bf16.mxu1 %v4451_v22 }
 0x307   : > { %2961 = vmatpush1.bf16.msra.mxu0 %v4446_v23 }
 0x308   : > { %3004 = vmatpush1.bf16.msra.mxu1 %v4449_v25  ;;  %2962 = vmatprep.subr.bf16.mxu0 %v4454_v1 }
 0x309   : > { %3005 = vmatprep.subr.bf16.mxu1 %v4457_v5 }
 0x30b   : > { %2963 = vmatpush1.bf16.msra.mxu0 %v4452_v28 }
 0x30c   : > { %3006 = vmatpush1.bf16.msra.mxu1 %v4455_v29  ;;  %2964 = vmatprep.subr.bf16.mxu0 %v4460_v30 }
 0x30d   : > { %3007 = vmatprep.subr.bf16.mxu1 %v4463_v4 }
 0x30f   : > { %2965 = vmatpush1.bf16.msra.mxu0 %v4458_v31 }
 0x310   : > { %3008 = vmatpush1.bf16.msra.mxu1 %v4461_v33  ;;  %2966 = vmatprep.subr.bf16.mxu0 %v4466_v34 }
 0x311   : > { %3009 = vmatprep.subr.bf16.mxu1 %v4469_v39 }
 0x313   : > { %2967 = vmatpush1.bf16.msra.mxu0 %v4464_v40 }
 0x314   : > { %3010 = vmatpush1.bf16.msra.mxu1 %v4467_v41  ;;  %2968 = vmatprep.subr.bf16.mxu0 %v4472_v63 }
 0x315   : > { %3011 = vmatprep.subr.bf16.mxu1 %v4475_v42 }
 0x317   : > { %2969 = vmatpush1.bf16.msra.mxu0 %v4470_v44 }
 0x318   : > { %3012 = vmatpush1.bf16.msra.mxu1 %v4473_v45  ;;  %2970 = vmatprep.subr.bf16.mxu0 %v4478_v19 }
 0x319   : > { %4034 = vmatprep.subr.bf16.mxu1 %v4545_v26 }
 0x31b   : > { %3030 = vmatmul.mubr.bf16.vlgmr.msra.gmra.mxu1 %v5511_v3  ;;  %2971 = vmatpush2.bf16.msra.mxu0 %v4476_v46  ;;  %v4497_v3 = vld [vmem:[%s5821_s5 + $0x308] ss:$16 sps:$4 sm:$0xff]  }
 0x31c   : > { %2972 = vmatprep.subr.bf16.mxu0 %v4481_v35  ;;  %4035 = vmatpush3.bf16.msra.mxu1 %v4650_v9 }
 0x31d   : > { %4036 = vmatprep.mubr.msk.bf16.mxu1 %vm4546_vm1, %v4545_v26  ;;  %4052 = vmatprep.subr.bf16.mxu1 %v4545_v26 }
 0x31f   : > { %2973 = vmatpush2.bf16.msra.mxu0 %v4479_v47 }
 0x320   : > { %2974 = vmatprep.subr.bf16.mxu0 %v4484_v48 }
 0x323   : > { %2975 = vmatpush2.bf16.msra.mxu0 %v4482_v57  ;;  %4037 = vmatmul.mubr.msk.bf16.vlgmr.msra.gmra.mxu1 %vm726_vm2, %v4500_v14 }
 0x324   : > { %2976 = vmatprep.subr.bf16.mxu0 %v4487_v36  ;;  %4060 = vmatprep.mubr.msk.bf16.mxu1 %vm4546_vm1, %v4545_v26 }
 0x327   : > { %2977 = vmatpush2.bf16.msra.mxu0 %v4485_v59 }
 0x328   : > { %2978 = vmatprep.subr.bf16.mxu0 %v4490_v50 }
 0x32b   : > { %2979 = vmatpush2.bf16.msra.mxu0 %v4488_v51 }
 0x32c   : > { %2980 = vmatprep.subr.bf16.mxu0 %v4493_v54 }
 0x32f   : > { %2981 = vmatpush2.bf16.msra.mxu0 %v4491_v55 }
 0x330   : > { %2982 = vmatprep.subr.bf16.mxu0 %v4496_v37 }
 0x333   : > { %2983 = vmatpush2.bf16.msra.mxu0 %v4494_v43 }
 0x334   : > { %2984 = vmatprep.subr.bf16.mxu0 %v4499_v58 }
 0x337   : > { %2985 = vmatpush2.bf16.msra.mxu0 %v4497_v3 }
 0x338   : > { %4028 = vmatprep.subr.bf16.mxu0 %v4545_v26 }
 0x33a   : > { %2987 = vmatmul.mubr.bf16.vlgmr.msra.gmra.mxu0 %v5006_v32  ;;  %v4502_v32 = vld [vmem:[%s5826_s10 + $0x18] sm:$0xff]  }
 0x33b   : > { %4029 = vmatpush3.bf16.msra.mxu0 %v4650_v9  ;;  %4030 = vmatprep.mubr.msk.bf16.mxu0 %vm4546_vm1, %v4545_v26  ;;  %v4503_v9 = vld [vmem:[%s5826_s10 + $0x38] sm:$0xff]  }
 0x33c   : > { %4040 = vmatprep.subr.bf16.mxu0 %v4545_v26  ;;  %4053 = vmatpush3.bf16.msra.mxu1 %v4503_v9 }
 0x33d   : > { %4054 = vmatprep.subr.bf16.mxu1 %v4545_v26 }
 0x340   : > { %4055 = vmatpush3.bf16.msra.mxu1 %v4505_v12 }
 0x341   : > { %4056 = vmatprep.subr.bf16.mxu1 %v4545_v26 }
 0x342   : > { %4031 = vmatmul.mubr.msk.bf16.vlgmr.msra.gmra.mxu0 %vm726_vm2, %v4501_v7 }
 0x343   : > { %4048 = vmatprep.mubr.msk.bf16.mxu0 %vm4546_vm1, %v4545_v26  ;;  %4041 = vmatpush3.bf16.msra.mxu0 %v4502_v32 }
 0x344   : > { %4042 = vmatprep.subr.bf16.mxu0 %v4545_v26  ;;  %4057 = vmatpush3.bf16.msra.mxu1 %v4507_v15 }
 0x345   : > { %4058 = vmatprep.subr.bf16.mxu1 %v4545_v26 }
 0x347   : > { %4043 = vmatpush3.bf16.msra.mxu0 %v4504_v8 }
 0x348   : > { %4044 = vmatprep.subr.bf16.mxu0 %v4545_v26  ;;  %4059 = vmatpush3.bf16.msra.mxu1 %v4509_v16 }
 0x349   : > { %3495 = vmatprep.subr.bf16.mxu1 %v4515_v20 }
 0x34b   : > { %4045 = vmatpush3.bf16.msra.mxu0 %v4506_v13 }
 0x34c   : > { %4046 = vmatprep.subr.bf16.mxu0 %v4545_v26  ;;  %v1960_v26 = vld [vmem:[%s5822_s6] sm:$0xf] }
 0x34d   : > { %v1965_v22 = vrot.slane %v1960_v26, %v5286_v17  ;;  %v1969_v23 = vrot.slane %v1960_v26, %v5289_v18 }
 0x34f   : > { %4047 = vmatpush3.bf16.msra.mxu0 %v4508_v62  ;;  %v1973_v62 = vrot.slane %v1960_v26, %v5345_v24 }
 0x350   : > { %3452 = vmatprep.subr.bf16.mxu0 %v4512_v11 }
 0x37a   : > { %v2859_v21 = vpop.f32.mrf.mxu1 }
 0x37c   : > { %v2861_v25 = vpop.f32.mrf.mxu1 }
 0x37e   : > { %v2863_v4 = vpop.f32.mrf.mxu1 }
 0x380   : > { %v2865_v63 = vpop.f32.mrf.mxu1 }
 0x39a   : > { %v2816_v1 = vpop.f32.mrf.mxu0 }
 0x39b   : > { %v2817_v5 = vadd.f32 %v2816_v1, %v1965_v22  ;;  %v659_v1 = vadd.f32 %v4908_v38, %v5365_v60 }
 0x39c   : > { %v2818_v28 = vpop.f32.mrf.mxu0 }
 0x39d   : > { %v2819_v29 = vadd.f32 %v2818_v28, %v1969_v23  ;;  %v2860_v30 = vadd.f32 %v2859_v21, %v2817_v5 }
 0x39e   : > { %v2820_v31 = vpop.f32.mrf.mxu0 }
 0x39f   : > { %v2821_v33 = vadd.f32 %v2820_v31, %v1965_v22  ;;  %v2862_v34 = vadd.f32 %v2861_v25, %v2819_v29  ;;  %v1602_v31 = vmax.f32 %v5393_v6, 0.0 }
 0x3a0   : > { %v2822_v39 = vpop.f32.mrf.mxu0 }
 0x3a1   : > { %v2823_v40 = vadd.f32 %v2822_v39, %v1969_v23  ;;  %v2864_v41 = vadd.f32 %v2863_v4, %v2821_v33 }
 0x3a3   : > { %v2866_v42 = vadd.f32 %v2865_v63, %v2823_v40 }
 0x3ba   : > { %v2902_v44 = vpop.f32.mrf.mxu0  ;;  %v2945_v43 = vpop.f32.mrf.mxu1 }
 0x3bb   : > { %v2903_v45 = vadd.f32 %v2902_v44, %v2860_v30  ;;  %v2946_v16 = vadd.f32 %v2945_v43, %v1973_v62  ;;  %v4513_v43 = vld [vmem:[%s5823_s7 + $0x68] ss:$16 sps:$4 sm:$0xff]  }
 0x3bc   : > { %v2904_v19 = vpop.f32.mrf.mxu0  ;;  %v2947_v58 = vpop.f32.mrf.mxu1 }
 0x3bd   : > { %v3040_v46 = vmax.f32 %v2903_v45, 0.0  ;;  %v2905_v35 = vadd.f32 %v2904_v19, %v2862_v34  ;;  %v4535_v45 = vld [vmem:[%s4641_s15] sm:$0xff]  }
 0x3be   : > { %v2906_v47 = vpop.f32.mrf.mxu0  ;;  %v2949_v3 = vpop.f32.mrf.mxu1  ;;  %v3056_v19 = vunpack.c.l.bf16 %v4535_v45 }
 0x3bf   : > { %v5718_v48 = vadd.f32 %v3040_v46, %v5308_v49  ;;  %v3041_v57 = vmax.f32 %v2905_v35, 0.0  ;;  %v2907_v14 = vadd.f32 %v2906_v47, %v2864_v41  ;;  %v2950_v22 = vadd.f32 %v2949_v3, %v1973_v62  ;;  %v4521_v3 = vld [vmem:[%s5823_s7 + $0x4c] ss:$16 sps:$4 sm:$0xff]  }
 0x3c0   : > { %v2908_v36 = vpop.f32.mrf.mxu0  ;;  %v2951_v49 = vpop.f32.mrf.mxu1  ;;  %v713_v41 = vmax.f32 %v659_v1, 0.0  ;;  %v3057_v47 = vunpack.c.h.bf16 %v4535_v45 }
 0x3c1   : > { %v5721_v59 = vadd.f32 %v3041_v57, %v5310_v52  ;;  %v3044_v50 = vmax.f32 %v2907_v14, 0.0  ;;  %v2909_v51 = vadd.f32 %v2908_v36, %v2866_v42 }
 0x3c2   : > { %v1610_v60 = vadd.f32 %v1602_v31, %v713_v41 }
 0x3c3   : > { %v5724_v54 = vadd.f32 %v3044_v50, %v5312_v61  ;;  %v3045_v55 = vmax.f32 %v2909_v51, 0.0  ;;  %v1977_v61 = vrot.slane %v1960_v26, %v5351_v27 }
 0x3c5   : > { %v5727_v37 = vadd.f32 %v3045_v55, %v5314_v56  ;;  %v2948_v56 = vadd.f32 %v2947_v58, %v1977_v61  ;;  %v2952_v28 = vadd.f32 %v2951_v49, %v1977_v61  ;;  %v4516_v49 = vld [vmem:[%s5823_s7 + $0x40] ss:$16 sps:$4 sm:$0xff]  }
 0x3db   : > { %v3031_v7 = vpop.f32.mrf.mxu1 }
 0x3dd   : > { %v3033_v32 = vpop.f32.mrf.mxu1 }
 0x3df   : > { %v3035_v9 = vpop.f32.mrf.mxu1 }
 0x3e1   : > { %v3037_v8 = vpop.f32.mrf.mxu1 }
 0x3e3   : > { %v3156_v12 = vpop.f32.mrf.mxu1 }
 0x3e5   : > { %v4038_v52 = vpop.f32.mrf.mxu1 }
 0x3e6   : > { %v4533_v52 = vld [vmem:[%s5823_s7 + $0xc] ss:$16 sps:$4 sm:$0xff]  }
 0x3e7   : > { %v3159_v13 = vpop.f32.mrf.mxu1 }
 0x3e9   : > { %v4039_v15 = vpop.f32.mrf.mxu1 }
 0x3ea   : > { %v4531_v15 = vld [vmem:[%s5823_s7 + $0x8] ss:$16 sps:$4 sm:$0xff]  }
 0x3fa   : > { %v2988_v11 = vpop.f32.mrf.mxu0 }
 0x3fb   : > { %v2989_v20 = vadd.f32 %v2988_v11, %v2946_v16 }
 0x3fc   : > { %v2990_v21 = vpop.f32.mrf.mxu0 }
 0x3fd   : > { %v3032_v23 = vadd.f32 %v3031_v7, %v2989_v20  ;;  %v2991_v25 = vadd.f32 %v2990_v21, %v2948_v56  ;;  %v4519_v7 = vld [vmem:[%s5823_s7 + $0x48] ss:$16 sps:$4 sm:$0xff]  }
 0x3fe   : > { %v2992_v5 = vpop.f32.mrf.mxu0 }
 0x3ff   : > { %v3042_v29 = vmax.f32 %v3032_v23, 0.0  ;;  %v3034_v30 = vadd.f32 %v3033_v32, %v2991_v25  ;;  %v2993_v4 = vadd.f32 %v2992_v5, %v2950_v22  ;;  %v4524_v32 = vld [vmem:[%s5823_s7 + $0x24] ss:$16 sps:$4 sm:$0xff]  }
 0x400   : > { %v2994_v26 = vpop.f32.mrf.mxu0 }
 0x401   : > { %v3043_v33 = vmax.f32 %v3034_v30, 0.0  ;;  %v3036_v34 = vadd.f32 %v3035_v9, %v2993_v4  ;;  %v2995_v39 = vadd.f32 %v2994_v26, %v2952_v28  ;;  %v5735_v40 = vadd.f32 %v3042_v29, %v5388_v53  ;;  %v4527_v9 = vld [vmem:[%s5823_s7 + $0x2c] ss:$16 sps:$4 sm:$0xff]   ;;  %v3339_v29 = vld [vmem:[%s5824_s8] sm:$0xf] }
 0x402   : > { %v3104_v63 = vpop.f32.mrf.mxu0  ;;  %v3344_v30 = vrot.slane %v3339_v29, %v5286_v17  ;;  %v3352_v4 = vrot.slane %v3339_v29, %v5345_v24  ;;  %v3348_v31 = vrot.slane %v3339_v29, %v5289_v18  ;;  %v3356_v26 = vrot.slane %v3339_v29, %v5351_v27 }
 0x403   : > { %v3046_v42 = vmax.f32 %v3036_v34, 0.0  ;;  %v3038_v44 = vadd.f32 %v3037_v8, %v2995_v39  ;;  %v5738_v38 = vadd.f32 %v3043_v33, %v5390_v0  ;;  %v3163_v6 = vmax.f32 %v3104_v63, %v3156_v12  ;;  %v4510_v0 = vld [vmem:[%s5823_s7 + $0x60] ss:$16 sps:$4 sm:$0xff]   ;;  %v4525_v12 = vld [vmem:[%s5823_s7 + $0x28] ss:$16 sps:$4 sm:$0xff]  }
 0x404   : > { %v4032_v46 = vpop.f32.mrf.mxu0  ;;  %v4522_v8 = vld [vmem:[%s5823_s7 + $0x20] ss:$16 sps:$4 sm:$0xff]  }
 0x405   : > { %v3047_v35 = vmax.f32 %v3038_v44, 0.0  ;;  %v5742_v57 = vadd.f32 %v3046_v42, %v5401_v10  ;;  %v3165_v51 = vmax.f32 %v3163_v6, %v3056_v19  ;;  %v4518_v10 = vld [vmem:[%s5823_s7 + $0x44] ss:$16 sps:$4 sm:$0xff]  }
 0x406   : > { %v3107_v14 = vpop.f32.mrf.mxu0 }
 0x407   : > { %v3164_v53 = vmax.f32 %v3107_v14, %v3159_v13  ;;  %v5744_v36 = vadd.f32 %v3047_v35, %v1610_v60  ;;  %v4528_v13 = vld [vmem:[%s5823_s7] ss:$16 sps:$4 sm:$0xff]  }
 0x408   : > { %v4033_v50 = vpop.f32.mrf.mxu0 }
 0x409   : > { %v3166_v55 = vmax.f32 %v3164_v53, %v3057_v47 }
 0x40b   : > { %v3167_v58 = vpack.c.bf16 %v3166_v55, %v3165_v51 }
 0x40d   : > { %4049 = vmatmul.mubr.msk.bf16.vlgmr.msra.gmra.mxu0 %vm571_vm0, %v3167_v58  ;;  %4061 = vmatmul.mubr.msk.bf16.vlgmr.msra.gmra.mxu1 %vm571_vm0, %v3167_v58 }
 0x40e   : > { %3453 = vmatpush1.bf16.msra.mxu0 %v4510_v0  ;;  %3496 = vmatpush1.bf16.msra.mxu1 %v4513_v43 }
 0x40f   : > { %3454 = vmatprep.subr.bf16.mxu0 %v4518_v10  ;;  %3497 = vmatprep.subr.bf16.mxu1 %v4521_v3 }
 0x410   : > { %3476 = vmatprep.mubr.bf16.mxu0 %v4544_v2  ;;  %3519 = vmatprep.mubr.bf16.mxu1 %v4544_v2  ;;  %v4530_v2 = vld [vmem:[%s5823_s7 + $0x4] ss:$16 sps:$4 sm:$0xff]  }
 0x412   : > { %3455 = vmatpush1.bf16.msra.mxu0 %v4516_v49  ;;  %3498 = vmatpush1.bf16.msra.mxu1 %v4519_v7 }
 0x413   : > { %3456 = vmatprep.subr.bf16.mxu0 %v4524_v32  ;;  %3499 = vmatprep.subr.bf16.mxu1 %v4527_v9 }
 0x416   : > { %3457 = vmatpush1.bf16.msra.mxu0 %v4522_v8  ;;  %3500 = vmatpush1.bf16.msra.mxu1 %v4525_v12 }
 0x417   : > { %3458 = vmatprep.subr.bf16.mxu0 %v4530_v2  ;;  %3501 = vmatprep.subr.bf16.mxu1 %v4533_v52 }
 0x41a   : > { %3459 = vmatpush1.bf16.msra.mxu0 %v4528_v13  ;;  %3502 = vmatpush1.bf16.msra.mxu1 %v4531_v15 }
 0x4cd   : > { %v3237_v62 = vpop.f32.mrf.mxu0  ;;  %v3311_v61 = vpop.f32.mrf.mxu1 }
 0x4ce   : > { %v3318_v56 = vmax.f32 %v3237_v62, %v3311_v61 }
 0x4cf   : > { %v4050_v16 = vpop.f32.mrf.mxu0  ;;  %v4062_v11 = vpop.f32.mrf.mxu1 }
 0x4d0   : > { %v3320_v1 = vmax.f32 %v3318_v56, %v3165_v51 }
 0x4d1   : > { %v3240_v20 = vpop.f32.mrf.mxu0  ;;  %v3314_v21 = vpop.f32.mrf.mxu1 }
 0x4d2   : > { %v3319_v22 = vmax.f32 %v3240_v20, %v3314_v21 }
 0x4d3   : > { %v4051_v23 = vpop.f32.mrf.mxu0  ;;  %v4063_v25 = vpop.f32.mrf.mxu1 }
 0x4d4   : > { %v3321_v5 = vmax.f32 %v3319_v22, %v3166_v55 }
 0x4d6   : > { %v3322_v28 = vpack.c.bf16 %v3321_v5, %v3320_v1 }
 0x4d8   : > { %3960 = vmatmul.mubr.msk.bf16.vlgmr.msra.gmra.mxu0 %vm571_vm0, %v3322_v28  ;;  %3961 = vmatmul.mubr.msk.bf16.vlgmr.msra.gmra.mxu1 %vm571_vm0, %v3322_v28 }
 0x598   : > { %v3478_v33 = vpop.f32.mrf.mxu0  ;;  %v3521_v34 = vpop.f32.mrf.mxu1 }
 0x599   : > { %v3479_v39 = vadd.f32 %v3478_v33, %v3344_v30  ;;  %v3522_v41 = vadd.f32 %v3521_v34, %v3352_v4 }
 0x59a   : > { %v3480_v63 = vpop.f32.mrf.mxu0  ;;  %v3523_v42 = vpop.f32.mrf.mxu1 }
 0x59b   : > { %v3530_v44 = vmax.f32 %v3479_v39, 0.0  ;;  %v3532_v60 = vmax.f32 %v3522_v41, 0.0  ;;  %v3481_v45 = vadd.f32 %v3480_v63, %v3348_v31  ;;  %v3524_v19 = vadd.f32 %v3523_v42, %v3356_v26 }
 0x59c   : > { %v3482_v17 = vpop.f32.mrf.mxu0  ;;  %v3525_v24 = vpop.f32.mrf.mxu1 }
 0x59d   : > { %v3538_v18 = vadd.f32 %v3530_v44, %v5718_v48  ;;  %v3540_v27 = vadd.f32 %v3532_v60, %v5735_v40  ;;  %v3531_v46 = vmax.f32 %v3481_v45, 0.0  ;;  %v3533_v35 = vmax.f32 %v3524_v19, 0.0 }
 0x59e   : > { %v3483_v6 = vadd.f32 %v3482_v17, %v3344_v30  ;;  %v3526_v47 = vadd.f32 %v3525_v24, %v3352_v4  ;;  %v3484_v14 = vpop.f32.mrf.mxu0  ;;  %v3527_v53 = vpop.f32.mrf.mxu1 }
 0x59f   : > { %3546 = vst [vmem:[%s386_s27] sm:$0xff] %v3538_v18  ;;  %3548 = vst [vmem:[%s386_s27 + $0x10] sm:$0xff] %v3540_v27  ;;  %v3539_v50 = vadd.f32 %v3531_v46, %v5721_v59  ;;  %v3541_v51 = vadd.f32 %v3533_v35, %v5738_v38  ;;  %v3485_v55 = vadd.f32 %v3484_v14, %v3348_v31 }
 0x5a0   : > { %v3528_v0 = vadd.f32 %v3527_v53, %v3356_v26  ;;  %v3534_v43 = vmax.f32 %v3483_v6, 0.0  ;;  %v3536_v58 = vmax.f32 %v3526_v47, 0.0 }
 0x5a1   : > { %3547 = vst [vmem:[%s386_s27 + $0x8] sm:$0xff] %v3539_v50  ;;  %3549 = vst [vmem:[%s386_s27 + $0x18] sm:$0xff] %v3541_v51  ;;  %v3535_v48 = vmax.f32 %v3485_v55, 0.0 }
 0x5a2   : > { %v3537_v40 = vmax.f32 %v3528_v0, 0.0  ;;  %v3542_v10 = vadd.f32 %v3534_v43, %v5724_v54  ;;  %v3544_v3 = vadd.f32 %v3536_v58, %v5742_v57 }
 0x5a3   : > { %v3543_v49 = vadd.f32 %v3535_v48, %v5727_v37 }
 0x5a4   : > { %v3545_v7 = vadd.f32 %v3537_v40, %v5744_v36  ;;  %3550 = vst [vmem:[%s386_s27 + $0x20] sm:$0xff] %v3542_v10  ;;  %3552 = vst [vmem:[%s386_s27 + $0x30] sm:$0xff] %v3544_v3 }
 0x5a5   : > { %3551 = vst [vmem:[%s386_s27 + $0x28] sm:$0xff] %v3543_v49 }
 0x5a6   : > { %3553 = vst [vmem:[%s386_s27 + $0x38] sm:$0xff] %v3545_v7 }
 0x5a7 PF: > { %s21_s17 = sadd.s32 1, %s4542_s17  }
 0x5a8   : > { %p18_p4 = scmp.ge.s32.totalorder %s21_s17, 4  }
 0x5aa   :  { %20 = sbr.rel (!%p18_p4) target bundleno = 1 (0x1), region = 100 }

</bundles_post_ra>
